<compile_context>
chip_gen: v5e
topology: v5e:2x2
jax: 0.10.0
libtpu: 0.0.40
codegen_flags: <defaults>
</compile_context>

<pallas_src>
import functools

import jax
import jax.numpy as jnp
from jax.experimental import pallas as pl
from jax.experimental.pallas import tpu as pltpu


def _sigmoid(h):
    """sigmoid(x) = 0.5 * tanh(0.5 * x) + 0.5.

    tanh is a single EUP instruction; the mul/add land on the VPU, which has
    slack in this kernel.  Works in the dtype of `h` (f32 or bf16).
    """
    half = jnp.asarray(0.5, h.dtype)
    return half * jnp.tanh(half * h) + half


def _autoencoder_kernel(x_ref,
                        w1_ref, b1_ref,
                        w2_ref, b2_ref,
                        w3_ref, b3_ref,
                        w4_ref, b4_ref,
                        o_ref,
                        *, epi_dtype):
    """Fused encoder+decoder forward for one batch tile.

    encoder: sigmoid(sigmoid(x @ W1 + b1) @ W2 + b2)
    decoder: sigmoid(sigmoid(h  @ W3 + b3) @ W4 + b4)

    Matmul inputs are bf16 (MXU-native), accumulation + bias add are f32,
    sigmoid + hand-off to the next matmul run in `epi_dtype` (bf16 on
    v6e/v7x, f32 on v5e).  The final sigmoid is f32 for output accuracy.
    """
    x = x_ref[...].astype(jnp.bfloat16)                      # (tile, 784)

    # Encoder layer 1: 784 -> 256
    h = jnp.dot(x, w1_ref[...], preferred_element_type=jnp.float32) + b1_ref[...]
    h = _sigmoid(h.astype(epi_dtype))

    # Encoder layer 2: 256 -> 128
    h = jnp.dot(h.astype(jnp.bfloat16), w2_ref[...],
                preferred_element_type=jnp.float32) + b2_ref[...]
    h = _sigmoid(h.astype(epi_dtype))

    # Decoder layer 1: 128 -> 256
    h = jnp.dot(h.astype(jnp.bfloat16), w3_ref[...],
                preferred_element_type=jnp.float32) + b3_ref[...]
    h = _sigmoid(h.astype(epi_dtype))

    # Decoder layer 2: 256 -> 784 (final sigmoid in f32 for accuracy)
    h = jnp.dot(h.astype(jnp.bfloat16), w4_ref[...],
                preferred_element_type=jnp.float32) + b4_ref[...]
    o_ref[...] = _sigmoid(h).astype(o_ref.dtype)


def prepare_params(params):
    """One-time glue, outside the jitted forward: transpose weights to
    (in, out) and cast to bf16 for the MXU; reshape biases to (1, out) f32."""
    return {
        "w1": params["w1"].T.astype(jnp.bfloat16),   # (784, 256)
        "w2": params["w2"].T.astype(jnp.bfloat16),   # (256, 128)
        "w3": params["w3"].T.astype(jnp.bfloat16),   # (128, 256)
        "w4": params["w4"].T.astype(jnp.bfloat16),   # (256, 784)
        "b1": params["b1"].reshape(1, -1).astype(jnp.float32),
        "b2": params["b2"].reshape(1, -1).astype(jnp.float32),
        "b3": params["b3"].reshape(1, -1).astype(jnp.float32),
        "b4": params["b4"].reshape(1, -1).astype(jnp.float32),
    }


def _ceil_to(x, m):
    return ((x + m - 1) // m) * m


def _epilogue_dtype():
    """bf16 epilogue on chips with a bf16 VPU/EUP (v6e and newer); f32 on
    v5e and earlier (and as a safe fallback)."""
    try:
        kind = jax.devices()[0].device_kind.lower()
    except Exception:
        return jnp.float32
    for old in ("v2", "v3", "v4", "v5"):
        if old in kind:
            return jnp.float32
    return jnp.bfloat16


@functools.partial(jax.jit, static_argnames=("batch_tile", "out_dtype"))
def autoencoder_forward(x, prepped, batch_tile=1024, out_dtype=jnp.float32):
    """x: (B, 784) float32.  prepped: output of prepare_params()."""
    B, D_in = x.shape
    assert D_in == 784

    # Batch tile: default 1024 rows.  For 8 < B <= 2*tile split into >= 2
    # grid steps so the 'parallel' batch axis has work for both v7x
    # TensorCores.  No padding: grid = cdiv(B, tile); the ragged last block
    # is handled by Pallas' masked edge block.
    if B <= 8:
        eff_tile = 8
    else:
        eff_tile = min(batch_tile, _ceil_to((B + 1) // 2, 8))
    num_blocks = pl.cdiv(B, eff_tile)

    w1, w2, w3, w4 = prepped["w1"], prepped["w2"], prepped["w3"], prepped["w4"]
    b1, b2, b3, b4 = prepped["b1"], prepped["b2"], prepped["b3"], prepped["b4"]

    # Weights/biases (<1 MiB in bf16) stay fully VMEM-resident: constant
    # index_map -> DMA'd once, reused for every grid step.
    # (pipeline_mode=pl.Buffered(1) would save another ~1 MiB if VMEM were
    # tight; unnecessary at this footprint.)
    def resident(shape):
        return pl.BlockSpec(shape, lambda i: tuple(0 for _ in shape))

    weight_elems = 784 * 256 + 256 * 128 + 128 * 256 + 256 * 784   # 466944
    bias_elems = 256 + 128 + 256 + 784                             # 1424
    out_bytes = jnp.dtype(out_dtype).itemsize
    cost = pl.CostEstimate(
        flops=2 * B * weight_elems,
        transcendentals=B * bias_elems,            # one tanh per activation
        bytes_accessed=(B * 784 * (4 + out_bytes)  # f32 in + out writeback
                        + weight_elems * 2 + bias_elems * 4),
    )

    epi_dtype = _epilogue_dtype()

    out = pl.pallas_call(
        functools.partial(_autoencoder_kernel, epi_dtype=epi_dtype),
        out_shape=jax.ShapeDtypeStruct((B, 784), out_dtype),
        grid_spec=pltpu.PrefetchScalarGridSpec(
            num_scalar_prefetch=0,
            grid=(num_blocks,),
            in_specs=[
                pl.BlockSpec((eff_tile, 784), lambda i: (i, 0)),   # x tile (f32)
                resident(w1.shape), resident(b1.shape),
                resident(w2.shape), resident(b2.shape),
                resident(w3.shape), resident(b3.shape),
                resident(w4.shape), resident(b4.shape),
            ],
            out_specs=pl.BlockSpec((eff_tile, 784), lambda i: (i, 0)),
        ),
        compiler_params=pltpu.CompilerParams(
            dimension_semantics=("parallel",),   # batch grid shards across TCs
            vmem_limit_bytes=32 * 1024 * 1024,
        ),
        cost_estimate=cost,
    )(x, w1, b1, w2, b2, w3, b3, w4, b4)

    return out


def init_params(key):
    """Deterministic parameter init matching nn.Linear shapes (out, in)."""
    shapes = {
        "w1": (256, 784), "b1": (256,),
        "w2": (128, 256), "b2": (128,),
        "w3": (256, 128), "b3": (256,),
        "w4": (784, 256), "b4": (784,),
    }
    params = {}
    keys = jax.random.split(key, len(shapes))
    for k, (name, shape) in zip(keys, sorted(shapes.items())):
        fan_in = shape[-1] if len(shape) == 2 else shapes["w" + name[1]][1]
        bound = 1.0 / jnp.sqrt(jnp.float32(fan_in))
        params[name] = jax.random.uniform(
            k, shape, dtype=jnp.float32, minval=-bound, maxval=bound)
    return params


def reference_forward(x, params):
    """Plain-JAX f32 reference matching PyTorch semantics."""
    h = jax.nn.sigmoid(x @ params["w1"].T + params["b1"])
    h = jax.nn.sigmoid(h @ params["w2"].T + params["b2"])
    h = jax.nn.sigmoid(h @ params["w3"].T + params["b3"])
    h = jax.nn.sigmoid(h @ params["w4"].T + params["b4"])
    return h


if __name__ == "__main__":
    key = jax.random.PRNGKey(0)
    pkey, xkey = jax.random.split(key)

    params = init_params(pkey)
    prepped = prepare_params(params)   # one-time transpose/reshape/bf16 cast

    # Small MNIST-like batch; deliberately not tile-aligned so the ragged
    # last-block path (masked edge block, no padding) is exercised, and
    # B > 8 so the batch splits into 2 grid steps.
    B = 12
    x = jax.random.uniform(xkey, (B, 784), dtype=jnp.float32)

    out = autoencoder_forward(x, prepped)
    out = jax.block_until_ready(out)

    ref = reference_forward(x, params)
    assert out.shape == (B, 784)
    assert bool(jnp.all(jnp.isfinite(out)))
    # bf16 MXU inputs + bf16 epilogue on v6e/v7x -> relaxed tolerance vs f32.
    assert jnp.allclose(out, ref, atol=3e-2), "mismatch vs reference"

    print("KERNEL_OK")
</pallas_src>

<mosaic_0001>
module attributes {stable_mosaic.version = 11 : i64} {
  func.func @_autoencoder_kernel(%arg0: i32, %arg1: memref<8x784xf32, #tpu.memory_space<vmem>>, %arg2: memref<784x256xbf16, #tpu.memory_space<vmem>>, %arg3: memref<1x256xf32, #tpu.memory_space<vmem>>, %arg4: memref<256x128xbf16, #tpu.memory_space<vmem>>, %arg5: memref<1x128xf32, #tpu.memory_space<vmem>>, %arg6: memref<128x256xbf16, #tpu.memory_space<vmem>>, %arg7: memref<1x256xf32, #tpu.memory_space<vmem>>, %arg8: memref<256x784xbf16, #tpu.memory_space<vmem>>, %arg9: memref<1x784xf32, #tpu.memory_space<vmem>>, %arg10: memref<8x784xf32, #tpu.memory_space<vmem>>) attributes {dimension_semantics = [#tpu.dimension_semantics<parallel>], iteration_bounds = array<i64: 2>, scalar_prefetch = 0 : i64, scratch_operands = 0 : i64, tpu.core_type = #tpu.core_type<tc>, window_params = [{transform_indices = @transform_0, window_bounds = array<i64: 8, 784>}, {pipeline_mode = #tpu.pipeline_mode<synchronous>, transform_indices = @transform_1, window_bounds = array<i64: 784, 256>}, {pipeline_mode = #tpu.pipeline_mode<synchronous>, transform_indices = @transform_2, window_bounds = array<i64: 1, 256>}, {pipeline_mode = #tpu.pipeline_mode<synchronous>, transform_indices = @transform_3, window_bounds = array<i64: 256, 128>}, {pipeline_mode = #tpu.pipeline_mode<synchronous>, transform_indices = @transform_4, window_bounds = array<i64: 1, 128>}, {pipeline_mode = #tpu.pipeline_mode<synchronous>, transform_indices = @transform_5, window_bounds = array<i64: 128, 256>}, {pipeline_mode = #tpu.pipeline_mode<synchronous>, transform_indices = @transform_6, window_bounds = array<i64: 1, 256>}, {pipeline_mode = #tpu.pipeline_mode<synchronous>, transform_indices = @transform_7, window_bounds = array<i64: 256, 784>}, {pipeline_mode = #tpu.pipeline_mode<synchronous>, transform_indices = @transform_8, window_bounds = array<i64: 1, 784>}, {transform_indices = @transform_9, window_bounds = array<i64: 8, 784>}]} {
    %c0 = arith.constant 0 : index
    %c0_0 = arith.constant 0 : index
    %0 = vector.load %arg1[%c0, %c0_0] : memref<8x784xf32, #tpu.memory_space<vmem>>, vector<8x784xf32>
    %1 = arith.truncf %0 : vector<8x784xf32> to vector<8x784xbf16>
    %c0_1 = arith.constant 0 : index
    %c0_2 = arith.constant 0 : index
    %2 = vector.load %arg2[%c0_1, %c0_2] : memref<784x256xbf16, #tpu.memory_space<vmem>>, vector<784x256xbf16>
    %cst = arith.constant dense<0.000000e+00> : vector<8x256xf32>
    %3 = tpu.matmul %1, %2, %cst {dimension_numbers = #tpu.dot_dimension_numbers<[1], [0], [0], [1], [0, 0, 1, 1], [], []>} : vector<8x784xbf16>, vector<784x256xbf16>, vector<8x256xf32> -> vector<8x256xf32>
    %c0_3 = arith.constant 0 : index
    %c0_4 = arith.constant 0 : index
    %4 = vector.load %arg3[%c0_3, %c0_4] : memref<1x256xf32, #tpu.memory_space<vmem>>, vector<1x256xf32>
    %5 = vector.broadcast %4 : vector<1x256xf32> to vector<8x256xf32>
    %6 = arith.addf %3, %5 : vector<8x256xf32>
    %7 = arith.truncf %6 : vector<8x256xf32> to vector<8x256xbf16>
    %cst_5 = arith.constant 5.000000e-01 : bf16
    %8 = vector.broadcast %cst_5 : bf16 to vector<8x256xbf16>
    %9 = arith.mulf %8, %7 : vector<8x256xbf16>
    %10 = math.tanh %9 : vector<8x256xbf16>
    %cst_6 = arith.constant 5.000000e-01 : bf16
    %11 = vector.broadcast %cst_6 : bf16 to vector<8x256xbf16>
    %12 = arith.mulf %11, %10 : vector<8x256xbf16>
    %cst_7 = arith.constant 5.000000e-01 : bf16
    %13 = vector.broadcast %cst_7 : bf16 to vector<8x256xbf16>
    %14 = arith.addf %12, %13 : vector<8x256xbf16>
    %c0_8 = arith.constant 0 : index
    %c0_9 = arith.constant 0 : index
    %15 = vector.load %arg4[%c0_8, %c0_9] : memref<256x128xbf16, #tpu.memory_space<vmem>>, vector<256x128xbf16>
    %cst_10 = arith.constant dense<0.000000e+00> : vector<8x128xf32>
    %16 = tpu.matmul %14, %15, %cst_10 {dimension_numbers = #tpu.dot_dimension_numbers<[1], [0], [0], [1], [0, 0, 1, 1], [], []>} : vector<8x256xbf16>, vector<256x128xbf16>, vector<8x128xf32> -> vector<8x128xf32>
    %c0_11 = arith.constant 0 : index
    %c0_12 = arith.constant 0 : index
    %17 = vector.load %arg5[%c0_11, %c0_12] : memref<1x128xf32, #tpu.memory_space<vmem>>, vector<1x128xf32>
    %18 = vector.broadcast %17 : vector<1x128xf32> to vector<8x128xf32>
    %19 = arith.addf %16, %18 : vector<8x128xf32>
    %20 = arith.truncf %19 : vector<8x128xf32> to vector<8x128xbf16>
    %cst_13 = arith.constant 5.000000e-01 : bf16
    %21 = vector.broadcast %cst_13 : bf16 to vector<8x128xbf16>
    %22 = arith.mulf %21, %20 : vector<8x128xbf16>
    %23 = math.tanh %22 : vector<8x128xbf16>
    %cst_14 = arith.constant 5.000000e-01 : bf16
    %24 = vector.broadcast %cst_14 : bf16 to vector<8x128xbf16>
    %25 = arith.mulf %24, %23 : vector<8x128xbf16>
    %cst_15 = arith.constant 5.000000e-01 : bf16
    %26 = vector.broadcast %cst_15 : bf16 to vector<8x128xbf16>
    %27 = arith.addf %25, %26 : vector<8x128xbf16>
    %c0_16 = arith.constant 0 : index
    %c0_17 = arith.constant 0 : index
    %28 = vector.load %arg6[%c0_16, %c0_17] : memref<128x256xbf16, #tpu.memory_space<vmem>>, vector<128x256xbf16>
    %cst_18 = arith.constant dense<0.000000e+00> : vector<8x256xf32>
    %29 = tpu.matmul %27, %28, %cst_18 {dimension_numbers = #tpu.dot_dimension_numbers<[1], [0], [0], [1], [0, 0, 1, 1], [], []>} : vector<8x128xbf16>, vector<128x256xbf16>, vector<8x256xf32> -> vector<8x256xf32>
    %c0_19 = arith.constant 0 : index
    %c0_20 = arith.constant 0 : index
    %30 = vector.load %arg7[%c0_19, %c0_20] : memref<1x256xf32, #tpu.memory_space<vmem>>, vector<1x256xf32>
    %31 = vector.broadcast %30 : vector<1x256xf32> to vector<8x256xf32>
    %32 = arith.addf %29, %31 : vector<8x256xf32>
    %33 = arith.truncf %32 : vector<8x256xf32> to vector<8x256xbf16>
    %cst_21 = arith.constant 5.000000e-01 : bf16
    %34 = vector.broadcast %cst_21 : bf16 to vector<8x256xbf16>
    %35 = arith.mulf %34, %33 : vector<8x256xbf16>
    %36 = math.tanh %35 : vector<8x256xbf16>
    %cst_22 = arith.constant 5.000000e-01 : bf16
    %37 = vector.broadcast %cst_22 : bf16 to vector<8x256xbf16>
    %38 = arith.mulf %37, %36 : vector<8x256xbf16>
    %cst_23 = arith.constant 5.000000e-01 : bf16
    %39 = vector.broadcast %cst_23 : bf16 to vector<8x256xbf16>
    %40 = arith.addf %38, %39 : vector<8x256xbf16>
    %c0_24 = arith.constant 0 : index
    %c0_25 = arith.constant 0 : index
    %41 = vector.load %arg8[%c0_24, %c0_25] : memref<256x784xbf16, #tpu.memory_space<vmem>>, vector<256x784xbf16>
    %cst_26 = arith.constant dense<0.000000e+00> : vector<8x784xf32>
    %42 = tpu.matmul %40, %41, %cst_26 {dimension_numbers = #tpu.dot_dimension_numbers<[1], [0], [0], [1], [0, 0, 1, 1], [], []>} : vector<8x256xbf16>, vector<256x784xbf16>, vector<8x784xf32> -> vector<8x784xf32>
    %c0_27 = arith.constant 0 : index
    %c0_28 = arith.constant 0 : index
    %43 = vector.load %arg9[%c0_27, %c0_28] : memref<1x784xf32, #tpu.memory_space<vmem>>, vector<1x784xf32>
    %44 = vector.broadcast %43 : vector<1x784xf32> to vector<8x784xf32>
    %45 = arith.addf %42, %44 : vector<8x784xf32>
    %cst_29 = arith.constant 5.000000e-01 : f32
    %46 = vector.broadcast %cst_29 : f32 to vector<8x784xf32>
    %47 = arith.mulf %46, %45 : vector<8x784xf32>
    %48 = math.tanh %47 : vector<8x784xf32>
    %cst_30 = arith.constant 5.000000e-01 : f32
    %49 = vector.broadcast %cst_30 : f32 to vector<8x784xf32>
    %50 = arith.mulf %49, %48 : vector<8x784xf32>
    %cst_31 = arith.constant 5.000000e-01 : f32
    %51 = vector.broadcast %cst_31 : f32 to vector<8x784xf32>
    %52 = arith.addf %50, %51 : vector<8x784xf32>
    %c0_32 = arith.constant 0 : index
    %c0_33 = arith.constant 0 : index
    %53 = vector.load %arg10[%c0_32, %c0_33] : memref<8x784xf32, #tpu.memory_space<vmem>>, vector<8x784xf32>
    tpu.vector_store %arg10[%c0_32, %c0_33], %52 {strides = array<i32>} : memref<8x784xf32, #tpu.memory_space<vmem>>, vector<8x784xf32>,
    return
  }
  func.func @transform_0(%arg0: i32) -> (i32, i32) {
    %c0_i32 = arith.constant 0 : i32
    %c0_i32_0 = arith.constant 0 : i32
    return %arg0, %c0_i32 : i32, i32
  }
  func.func @transform_1(%arg0: i32) -> (i32, i32) {
    %c0_i32 = arith.constant 0 : i32
    %c0_i32_0 = arith.constant 0 : i32
    %c0_i32_1 = arith.constant 0 : i32
    return %c0_i32, %c0_i32_0 : i32, i32
  }
  func.func @transform_2(%arg0: i32) -> (i32, i32) {
    %c0_i32 = arith.constant 0 : i32
    %c0_i32_0 = arith.constant 0 : i32
    %c0_i32_1 = arith.constant 0 : i32
    return %c0_i32, %c0_i32_0 : i32, i32
  }
  func.func @transform_3(%arg0: i32) -> (i32, i32) {
    %c0_i32 = arith.constant 0 : i32
    %c0_i32_0 = arith.constant 0 : i32
    %c0_i32_1 = arith.constant 0 : i32
    return %c0_i32, %c0_i32_0 : i32, i32
  }
  func.func @transform_4(%arg0: i32) -> (i32, i32) {
    %c0_i32 = arith.constant 0 : i32
    %c0_i32_0 = arith.constant 0 : i32
    %c0_i32_1 = arith.constant 0 : i32
    return %c0_i32, %c0_i32_0 : i32, i32
  }
  func.func @transform_5(%arg0: i32) -> (i32, i32) {
    %c0_i32 = arith.constant 0 : i32
    %c0_i32_0 = arith.constant 0 : i32
    %c0_i32_1 = arith.constant 0 : i32
    return %c0_i32, %c0_i32_0 : i32, i32
  }
  func.func @transform_6(%arg0: i32) -> (i32, i32) {
    %c0_i32 = arith.constant 0 : i32
    %c0_i32_0 = arith.constant 0 : i32
    %c0_i32_1 = arith.constant 0 : i32
    return %c0_i32, %c0_i32_0 : i32, i32
  }
  func.func @transform_7(%arg0: i32) -> (i32, i32) {
    %c0_i32 = arith.constant 0 : i32
    %c0_i32_0 = arith.constant 0 : i32
    %c0_i32_1 = arith.constant 0 : i32
    return %c0_i32, %c0_i32_0 : i32, i32
  }
  func.func @transform_8(%arg0: i32) -> (i32, i32) {
    %c0_i32 = arith.constant 0 : i32
    %c0_i32_0 = arith.constant 0 : i32
    %c0_i32_1 = arith.constant 0 : i32
    return %c0_i32, %c0_i32_0 : i32, i32
  }
  func.func @transform_9(%arg0: i32) -> (i32, i32) {
    %c0_i32 = arith.constant 0 : i32
    %c0_i32_0 = arith.constant 0 : i32
    return %arg0, %c0_i32 : i32, i32
  }
}

</mosaic_0001>

<bundles_post_ra>
// kernel: autoencoder_forward.1
= control target key start
LH: loop header
LB: loop body
LE: loop exit
PB: predicated region body
PF: predicated region fallthrough
CT: control target
= control target key end

     0   :  { %s5468_s0 = inlined_call_operand.vmem [shape: f32[12,784], index: 0, kind: input, shape index: {}]   ;;  %s5469_s1 = inlined_call_operand.vmem [shape: bf16[784,256], index: 1, kind: input, shape index: {}]   ;;  %s5470_s2 = inlined_call_operand.vmem [shape: f32[1,256], index: 2, kind: input, shape index: {}]   ;;  %s5471_s3 = inlined_call_operand.vmem [shape: bf16[256,128], index: 3, kind: input, shape index: {}]   ;;  %s5472_s4 = inlined_call_operand.vmem [shape: f32[1,128], index: 4, kind: input, shape index: {}]   ;;  %s5473_s5 = inlined_call_operand.vmem [shape: bf16[128,256], index: 5, kind: input, shape index: {}]   ;;  %s5474_s6 = inlined_call_operand.vmem [shape: f32[1,256], index: 6, kind: input, shape index: {}]   ;;  %s5475_s7 = inlined_call_operand.vmem [shape: bf16[256,784], index: 7, kind: input, shape index: {}]   ;;  %s5476_s8 = inlined_call_operand.vmem [shape: f32[1,784], index: 8, kind: input, shape index: {}]   ;;  %s5477_s9 = inlined_call_operand.hbm [shape: f32[12,784], index: 9, kind: output, shape index: {}]  }
   0x1   :  { %5478 = sst [smem:[#allocation5_spill]] %s5468_s0 }
   0x2   :  { %14 = vsyncpa [#allocation3], 0 }
   0x3   :  { %16 = vsyncpa [#allocation3 + $0x1], 0  ;;  %s3883_s30 = smov 0   ;;  %s3885_s10 = smov 0  }
   0x4   :  { %s3887_s11 = smov 0   ;;  %s3889_s12 = smov 0  }
   0x5 LB: > { %s3904_s13 = sadd.s32 4294967295, %s3831_s12   ;;  %s2482_s14 = sadd.s32 4294967294, %s3831_s12   ;;  %s3831_s12 = sphi %s3889_s12, %s5485_s12   ;;  %s3827_s11 = sphi %s3887_s11, %s5484_s11   ;;  %s3823_s10 = sphi %s3885_s10, %s5483_s10   ;;  %s3819_s30 = sphi %s3883_s30, %s5482_s30  }
   0x6   : > { %s3908_s15 = sadd.s32 1, %s3831_s12   ;;  %s223_s16 = sadd.s32 1, %s3827_s11 }
   0x7   : > { %s220_s17 = ssub.s32 %s3831_s12, %s3908_s15  ;;  %p233_p0 = scmp.ne.s32.totalorder %s3827_s11, %s3823_s10 }
   0x8   : > { %p221_p1 = scmp.eq.s32.totalorder %s220_s17, 0  ;;  %p234_p2 = scmp.eq.s32.totalorder %s3904_s13, 1 }
   0x9   : > { %p239_p3 = scmp.ne.s32.totalorder %s3823_s10, %s3819_s30  ;;  %p240_p4 = scmp.eq.s32.totalorder %s2482_s14, 1 }
   0xa   : > { %s3919_s18 = scalar_select %p221_p1, %s3827_s11, %s223_s16  }
   0xb   : > { %p3921_p5 = por %p234_p2, %p233_p0  ;;  %p3925_p6 = por %p240_p4, %p239_p3 }
   0xc   : > { %p2485_p7 = scmp.ge.s32.totalorder %s3831_s12, 1  ;;  %p290_p8 = scmp.lt.s32.totalorder %s3831_s12, 3 }
   0xe   : > { %p291_p9 = pnand %p2485_p7, %p290_p8 }
   0xf   : > { %p326_p10 = scmp.lt.s32.totalorder (!%p291_p9), %s3904_s13, 1  ;;  %s5481_s0 = sld [smem:[#allocation5_spill]] (!%p291_p9) }
  0x10   : > { %294 = sbr.rel (%p291_p9) target bundleno = 841 (0x349), region = 56 }
  0x15   : > { %v2545_v0 = vld [vmem:[%s5469_s1 + $0x70] sm:$0xf]  ;;  %v3475_v1 = vld [vmem:[%s5469_s1 + $0x74] sm:$0xf0]  ;;  %v2537_v11 = vld [vmem:[%s5469_s1 + $0x60] sm:$0xf] }
  0x16   : > { %v2673_v2 = vld [vmem:[%s5469_s1 + $0x170] sm:$0xf]  ;;  %v2546_v3 = vor.u32 %v3475_v1, %v2545_v0  ;;  %v3507_v4 = vld [vmem:[%s5469_s1 + $0x174] sm:$0xf0]  ;;  %v3473_v13 = vld [vmem:[%s5469_s1 + $0x64] sm:$0xf0] }
  0x17   : > { %v2737_v5 = vld [vmem:[%s5469_s1 + $0x1f0] sm:$0xf]  ;;  %v3523_v6 = vld [vmem:[%s5469_s1 + $0x1f4] sm:$0xf0]  ;;  %v2674_v7 = vor.u32 %v3507_v4, %v2673_v2  ;;  %v2665_v14 = vld [vmem:[%s5469_s1 + $0x160] sm:$0xf]  ;;  %v2538_v16 = vor.u32 %v3473_v13, %v2537_v11 }
  0x18   : > { %v2738_v8 = vor.u32 %v3523_v6, %v2737_v5  ;;  %v2609_v9 = vld [vmem:[%s5469_s1 + $0xf0] sm:$0xf]  ;;  %v3491_v10 = vld [vmem:[%s5469_s1 + $0xf4] sm:$0xf0]  ;;  %944 = vmatpush.bf16.msra.mxu0 %v2546_v3  ;;  %v3505_v15 = vld [vmem:[%s5469_s1 + $0x164] sm:$0xf0] }
  0x19   : > { %v2610_v12 = vor.u32 %v3491_v10, %v2609_v9  ;;  %970 = vmatpush.bf16.msra.mxu2 %v2674_v7  ;;  %v2666_v17 = vor.u32 %v3505_v15, %v2665_v14  ;;  %v2729_v18 = vld [vmem:[%s5469_s1 + $0x1e0] sm:$0xf]  ;;  %v3521_v19 = vld [vmem:[%s5469_s1 + $0x1e4] sm:$0xf0]  ;;  %v2529_v23 = vld [vmem:[%s5469_s1 + $0x50] sm:$0xf] }
  0x1a   : > { %983 = vmatpush.bf16.msra.mxu3 %v2738_v8  ;;  %v2601_v20 = vld [vmem:[%s5469_s1 + $0xe0] sm:$0xf]  ;;  %v2730_v21 = vor.u32 %v3521_v19, %v2729_v18  ;;  %v3489_v22 = vld [vmem:[%s5469_s1 + $0xe4] sm:$0xf0]  ;;  %v3471_v24 = vld [vmem:[%s5469_s1 + $0x54] sm:$0xf0] }
  0x1b   : > { %957 = vmatpush.bf16.msra.mxu1 %v2610_v12  ;;  %v2602_v25 = vor.u32 %v3489_v22, %v2601_v20  ;;  %v2657_v26 = vld [vmem:[%s5469_s1 + $0x150] sm:$0xf]  ;;  %v3503_v27 = vld [vmem:[%s5469_s1 + $0x154] sm:$0xf0]  ;;  %v2530_v29 = vor.u32 %v3471_v24, %v2529_v23  ;;  %v2521_v35 = vld [vmem:[%s5469_s1 + $0x40] sm:$0xf] }
  0x1c   : > { %v2721_v28 = vld [vmem:[%s5469_s1 + $0x1d0] sm:$0xf]  ;;  %945 = vmatpush.bf16.msra.mxu0 %v2538_v16  ;;  %v3519_v30 = vld [vmem:[%s5469_s1 + $0x1d4] sm:$0xf0]  ;;  %v2658_v33 = vor.u32 %v3503_v27, %v2657_v26  ;;  %v3469_v36 = vld [vmem:[%s5469_s1 + $0x44] sm:$0xf0] }
  0x1d   : > { %v2593_v31 = vld [vmem:[%s5469_s1 + $0xd0] sm:$0xf]  ;;  %v3487_v32 = vld [vmem:[%s5469_s1 + $0xd4] sm:$0xf0]  ;;  %971 = vmatpush.bf16.msra.mxu2 %v2666_v17  ;;  %v2722_v34 = vor.u32 %v3519_v30, %v2721_v28  ;;  %v2649_v37 = vld [vmem:[%s5469_s1 + $0x140] sm:$0xf]  ;;  %v2522_v44 = vor.u32 %v3469_v36, %v2521_v35 }
  0x1e   : > { %984 = vmatpush.bf16.msra.mxu3 %v2730_v21  ;;  %v2594_v38 = vor.u32 %v3487_v32, %v2593_v31  ;;  %v3501_v39 = vld [vmem:[%s5469_s1 + $0x144] sm:$0xf0]  ;;  %v2713_v40 = vld [vmem:[%s5469_s1 + $0x1c0] sm:$0xf]  ;;  %v2513_v47 = vld [vmem:[%s5469_s1 + $0x30] sm:$0xf] }
  0x1f   : > { %958 = vmatpush.bf16.msra.mxu1 %v2602_v25  ;;  %v3517_v41 = vld [vmem:[%s5469_s1 + $0x1c4] sm:$0xf0]  ;;  %v2585_v42 = vld [vmem:[%s5469_s1 + $0xc0] sm:$0xf]  ;;  %v2650_v45 = vor.u32 %v3501_v39, %v2649_v37  ;;  %v3467_v48 = vld [vmem:[%s5469_s1 + $0x34] sm:$0xf0] }
  0x20   : > { %v3485_v43 = vld [vmem:[%s5469_s1 + $0xc4] sm:$0xf0]  ;;  %946 = vmatpush.bf16.msra.mxu0 %v2530_v29  ;;  %v2714_v46 = vor.u32 %v3517_v41, %v2713_v40  ;;  %v2641_v49 = vld [vmem:[%s5469_s1 + $0x130] sm:$0xf]  ;;  %v3499_v51 = vld [vmem:[%s5469_s1 + $0x134] sm:$0xf0]  ;;  %v2514_v56 = vor.u32 %v3467_v48, %v2513_v47 }
  0x21   : > { %972 = vmatpush.bf16.msra.mxu2 %v2658_v33  ;;  %v2586_v50 = vor.u32 %v3485_v43, %v2585_v42  ;;  %v2705_v52 = vld [vmem:[%s5469_s1 + $0x1b0] sm:$0xf]  ;;  %v3515_v53 = vld [vmem:[%s5469_s1 + $0x1b4] sm:$0xf0]  ;;  %v2642_v57 = vor.u32 %v3499_v51, %v2641_v49  ;;  %v2505_v59 = vld [vmem:[%s5469_s1 + $0x20] sm:$0xf] }
  0x22   : > { %985 = vmatpush.bf16.msra.mxu3 %v2722_v34  ;;  %v2577_v54 = vld [vmem:[%s5469_s1 + $0xb0] sm:$0xf]  ;;  %v3483_v55 = vld [vmem:[%s5469_s1 + $0xb4] sm:$0xf0]  ;;  %v2706_v58 = vor.u32 %v3515_v53, %v2705_v52  ;;  %v3465_v60 = vld [vmem:[%s5469_s1 + $0x24] sm:$0xf0] }
  0x23   : > { %959 = vmatpush.bf16.msra.mxu1 %v2594_v38  ;;  %v2633_v61 = vld [vmem:[%s5469_s1 + $0x120] sm:$0xf]  ;;  %v2578_v62 = vor.u32 %v3483_v55, %v2577_v54  ;;  %v3497_v63 = vld [vmem:[%s5469_s1 + $0x124] sm:$0xf0]  ;;  %v2506_v4 = vor.u32 %v3465_v60, %v2505_v59  ;;  %v2497_v5 = vld [vmem:[%s5469_s1 + $0x10] sm:$0xf] }
  0x24   : > { %947 = vmatpush.bf16.msra.mxu0 %v2522_v44  ;;  %v2697_v0 = vld [vmem:[%s5469_s1 + $0x1a0] sm:$0xf]  ;;  %v3513_v1 = vld [vmem:[%s5469_s1 + $0x1a4] sm:$0xf0]  ;;  %v3463_v6 = vld [vmem:[%s5469_s1 + $0x14] sm:$0xf0]  ;;  %v2634_v7 = vor.u32 %v3497_v63, %v2633_v61 }
  0x25   : > { %973 = vmatpush.bf16.msra.mxu2 %v2650_v45  ;;  %v2569_v2 = vld [vmem:[%s5469_s1 + $0xa0] sm:$0xf]  ;;  %v3481_v3 = vld [vmem:[%s5469_s1 + $0xa4] sm:$0xf0]  ;;  %v2698_v8 = vor.u32 %v3513_v1, %v2697_v0  ;;  %v2625_v9 = vld [vmem:[%s5469_s1 + $0x110] sm:$0xf]  ;;  %v2498_v18 = vor.u32 %v3463_v6, %v2497_v5 }
  0x26   : > { %986 = vmatpush.bf16.msra.mxu3 %v2714_v46  ;;  %v3495_v10 = vld [vmem:[%s5469_s1 + $0x114] sm:$0xf0]  ;;  %v2689_v11 = vld [vmem:[%s5469_s1 + $0x190] sm:$0xf]  ;;  %v2570_v12 = vor.u32 %v3481_v3, %v2569_v2  ;;  %v2489_v16 = vld [vmem:[%s5469_s1] sm:$0xf] }
  0x27   : > { %960 = vmatpush.bf16.msra.mxu1 %v2586_v50  ;;  %v3511_v13 = vld [vmem:[%s5469_s1 + $0x194] sm:$0xf0]  ;;  %v2561_v14 = vld [vmem:[%s5469_s1 + $0x90] sm:$0xf]  ;;  %v3461_v17 = vld [vmem:[%s5469_s1 + $0x4] sm:$0xf0]  ;;  %v2626_v22 = vor.u32 %v3495_v10, %v2625_v9 }
  0x28   : > { %948 = vmatpush.bf16.msra.mxu0 %v2514_v56  ;;  %v3479_v15 = vld [vmem:[%s5469_s1 + $0x94] sm:$0xf0]  ;;  %v2617_v19 = vld [vmem:[%s5469_s1 + $0x100] sm:$0xf]  ;;  %v3493_v20 = vld [vmem:[%s5469_s1 + $0x104] sm:$0xf0]  ;;  %v2690_v23 = vor.u32 %v3511_v13, %v2689_v11  ;;  %v2490_v32 = vor.u32 %v3461_v17, %v2489_v16 }
  0x29   : > { %974 = vmatpush.bf16.msra.mxu2 %v2642_v57  ;;  %v2681_v21 = vld [vmem:[%s5469_s1 + $0x180] sm:$0xf]  ;;  %v3509_v24 = vld [vmem:[%s5469_s1 + $0x184] sm:$0xf0]  ;;  %v2801_v25 = vld [vmem:[%s5469_s1 + $0x270] sm:$0xf]  ;;  %v2562_v26 = vor.u32 %v3479_v15, %v2561_v14  ;;  %v2618_v36 = vor.u32 %v3493_v20, %v2617_v19 }
  0x2a   : > { %987 = vmatpush.bf16.msra.mxu3 %v2706_v58  ;;  %s327_s27 = scalar_select %p326_p10, %s3904_s13, 1  ;;  %v3539_v27 = vld [vmem:[%s5469_s1 + $0x274] sm:$0xf0]  ;;  %v3474_v28 = vld [vmem:[%s5469_s1 + $0x74] sm:$0xf]  ;;  %v2682_v37 = vor.u32 %v3509_v24, %v2681_v21  ;;  %vm940_vm0 = vcmask 130048  }
  0x2b   : > { %961 = vmatpush.bf16.msra.mxu1 %v2578_v62  ;;  %v2547_v29 = vld [vmem:[%s5469_s1 + $0x78] sm:$0xf0]  ;;  %v2553_v30 = vld [vmem:[%s5469_s1 + $0x80] sm:$0xf]  ;;  %v3477_v31 = vld [vmem:[%s5469_s1 + $0x84] sm:$0xf0]  ;;  %v2802_v41 = vor.u32 %v3539_v27, %v2801_v25 }
  0x2c   : > { %949 = vmatpush.bf16.msra.mxu0 %v2506_v4  ;;  %s3703_s26 = smul.u32 56, %s327_s27  ;;  %v2865_v33 = vld [vmem:[%s5469_s1 + $0x2f0] sm:$0xf]  ;;  %v2873_v34 = vld [vmem:[%s5469_s1 + $0x300] sm:$0xf]  ;;  %v2550_v42 = vor.u32 %v3474_v28, %v2547_v29  ;;  %v2554_v46 = vor.u32 %v3477_v31, %v2553_v30 }
  0x2d   : > { %975 = vmatpush.bf16.msra.mxu2 %v2634_v7  ;;  %v3557_v35 = vld [vmem:[%s5469_s1 + $0x304] sm:$0xf0]  ;;  %v3555_v38 = vld [vmem:[%s5469_s1 + $0x2f4] sm:$0xf0]  ;;  %v3490_v39 = vld [vmem:[%s5469_s1 + $0xf4] sm:$0xf] }
  0x2e   : > { %988 = vmatpush.bf16.msra.mxu3 %v2698_v8  ;;  %s4149_s23 = scalar_lea.vmem %s5481_s0, %s3703_s26  ;;  %v2611_v40 = vld [vmem:[%s5469_s1 + $0xf8] sm:$0xf0]  ;;  %v2793_v44 = vld [vmem:[%s5469_s1 + $0x260] sm:$0xf]  ;;  %v3537_v45 = vld [vmem:[%s5469_s1 + $0x264] sm:$0xf0]  ;;  %v2874_v47 = vor.u32 %v3557_v35, %v2873_v34  ;;  %v2866_v52 = vor.u32 %v3555_v38, %v2865_v33 }
  0x2f   : > { %962 = vmatpush.bf16.msra.mxu1 %v2570_v12  ;;  %v334_v43 = vld [vmem:[%s4149_s23 + $0x10] sm:$0xff]  ;;  %v3472_v48 = vld [vmem:[%s5469_s1 + $0x64] sm:$0xf]  ;;  %v2539_v49 = vld [vmem:[%s5469_s1 + $0x68] sm:$0xf0]  ;;  %v2614_v54 = vor.u32 %v3490_v39, %v2611_v40  ;;  %v2794_v59 = vor.u32 %v3537_v45, %v2793_v44  ;;  %s323_s0 = sand.u32 1, %s3823_s10  }
  0x30   : > { %950 = vmatpush.bf16.msra.mxu0 %v2498_v18  ;;  %v332_v50 = vld [vmem:[%s4149_s23] sm:$0xff]  ;;  %v4174_v51 = vpack.c.bf16 %v334_v43, %v334_v43  ;;  %v335_v53 = vld [vmem:[%s4149_s23 + $0x18] sm:$0xff]  ;;  %v3553_v56 = vld [vmem:[%s5469_s1 + $0x2e4] sm:$0xf0]  ;;  %v2542_v60 = vor.u32 %v3472_v48, %v2539_v49  ;;  %s3702_s24 = smul.u32 56, %s323_s0  ;;  %s2407_s17 = scalar_lea.sflag [#allocation3], %s323_s0 }
  0x31   : > { %976 = vmatpush.bf16.msra.mxu2 %v2626_v22  ;;  %v2857_v55 = vld [vmem:[%s5469_s1 + $0x2e0] sm:$0xf]  ;;  %v4183_v57 = vpack.c.bf16 %v332_v50, %v332_v50  ;;  %v333_v58 = vld [vmem:[%s4149_s23 + $0x8] sm:$0xff]  ;;  %v3488_v61 = vld [vmem:[%s5469_s1 + $0xe4] sm:$0xf]  ;;  %v4204_v3 = vpack.c.bf16 %v335_v53, %v335_v53 }
  0x32   : > { %989 = vmatpush.bf16.msra.mxu3 %v2690_v23  ;;  %v2603_v62 = vld [vmem:[%s5469_s1 + $0xe8] sm:$0xf0]  ;;  %v2785_v63 = vld [vmem:[%s5469_s1 + $0x250] sm:$0xf]  ;;  %v3535_v0 = vld [vmem:[%s5469_s1 + $0x254] sm:$0xf0]  ;;  %v4206_v4 = vpack.c.bf16 %v333_v58, %v333_v58  ;;  %v2858_v5 = vor.u32 %v3553_v56, %v2857_v55 }
  0x33   : > { %963 = vmatpush.bf16.msra.mxu1 %v2562_v26  ;;  %v3470_v1 = vld [vmem:[%s5469_s1 + $0x54] sm:$0xf]  ;;  %v2531_v2 = vld [vmem:[%s5469_s1 + $0x58] sm:$0xf0]  ;;  %v2606_v6 = vor.u32 %v3488_v61, %v2603_v62  ;;  %v2849_v7 = vld [vmem:[%s5469_s1 + $0x2d0] sm:$0xf]  ;;  %v2786_v9 = vor.u32 %v3535_v0, %v2785_v63 }
  0x34   : > { %951 = vmatpush.bf16.msra.mxu0 %v2490_v32  ;;  %v3551_v8 = vld [vmem:[%s5469_s1 + $0x2d4] sm:$0xf0]  ;;  %v2534_v10 = vor.u32 %v3470_v1, %v2531_v2  ;;  %v3486_v11 = vld [vmem:[%s5469_s1 + $0xd4] sm:$0xf]  ;;  %v2595_v12 = vld [vmem:[%s5469_s1 + $0xd8] sm:$0xf0] }
  0x35   : > { %977 = vmatpush.bf16.msra.mxu2 %v2618_v36  ;;  %v2777_v13 = vld [vmem:[%s5469_s1 + $0x240] sm:$0xf]  ;;  %v3533_v14 = vld [vmem:[%s5469_s1 + $0x244] sm:$0xf0]  ;;  %v3468_v15 = vld [vmem:[%s5469_s1 + $0x44] sm:$0xf]  ;;  %v2850_v17 = vor.u32 %v3551_v8, %v2849_v7  ;;  %v2598_v18 = vor.u32 %v3486_v11, %v2595_v12 }
  0x36   : > { %990 = vmatpush.bf16.msra.mxu3 %v2682_v37  ;;  %v2523_v16 = vld [vmem:[%s5469_s1 + $0x48] sm:$0xf0]  ;;  %v2841_v19 = vld [vmem:[%s5469_s1 + $0x2c0] sm:$0xf]  ;;  %v3549_v20 = vld [vmem:[%s5469_s1 + $0x2c4] sm:$0xf0]  ;;  %v2778_v21 = vor.u32 %v3533_v14, %v2777_v13 }
  0x37   : > { %964 = vmatpush.bf16.msra.mxu1 %v2554_v46  ;;  %952 = vmatmul.bf16.vlgmr.msra.gmra.mxu0 %v4183_v57  ;;  %v2526_v22 = vor.u32 %v3468_v15, %v2523_v16  ;;  %v3484_v23 = vld [vmem:[%s5469_s1 + $0xc4] sm:$0xf]  ;;  %v2587_v24 = vld [vmem:[%s5469_s1 + $0xc8] sm:$0xf0]  ;;  %v2769_v25 = vld [vmem:[%s5469_s1 + $0x230] sm:$0xf]  ;;  %v2842_v29 = vor.u32 %v3549_v20, %v2841_v19 }
  0x38   : > { %996 = vmatpush.bf16.msrb.mxu0 %v2802_v41  ;;  %978 = vmatmul.bf16.vlgmr.msra.gmra.mxu2 %v4174_v51  ;;  %v3531_v26 = vld [vmem:[%s5469_s1 + $0x234] sm:$0xf0]  ;;  %v3466_v27 = vld [vmem:[%s5469_s1 + $0x34] sm:$0xf]  ;;  %v2515_v28 = vld [vmem:[%s5469_s1 + $0x38] sm:$0xf0]  ;;  %v2590_v30 = vor.u32 %v3484_v23, %v2587_v24 }
  0x39   : > { %1029 = vmatpush.bf16.msrb.mxu2 %v2874_v47  ;;  %991 = vmatmul.bf16.vlgmr.msra.gmra.mxu3 %v4204_v3  ;;  %v2833_v31 = vld [vmem:[%s5469_s1 + $0x2b0] sm:$0xf]  ;;  %v3547_v32 = vld [vmem:[%s5469_s1 + $0x2b4] sm:$0xf0]  ;;  %v2770_v34 = vor.u32 %v3531_v26, %v2769_v25  ;;  %v2518_v35 = vor.u32 %v3466_v27, %v2515_v28  ;;  %v3482_v36 = vld [vmem:[%s5469_s1 + $0xb4] sm:$0xf] }
  0x3a   : > { %1035 = vmatpush.bf16.msrb.mxu3 %v2550_v42  ;;  %965 = vmatmul.bf16.vlgmr.msra.gmra.mxu1 %v4206_v4  ;;  %v338_v33 = vld [vmem:[%s4149_s23 + $0x30] sm:$0xff]  ;;  %v2579_v37 = vld [vmem:[%s5469_s1 + $0xb8] sm:$0xf0]  ;;  %v2761_v38 = vld [vmem:[%s5469_s1 + $0x220] sm:$0xf]  ;;  %v2834_v42 = vor.u32 %v3547_v32, %v2833_v31  ;;  %s5421_s25 = scalar_lea.vmem [#allocation2], %s3702_s24 }
  0x3b   : > { %1009 = vmatpush.bf16.msrb.mxu1 %v2866_v52  ;;  %v3529_v39 = vld [vmem:[%s5469_s1 + $0x224] sm:$0xf0]  ;;  %v3464_v40 = vld [vmem:[%s5469_s1 + $0x24] sm:$0xf]  ;;  %v2507_v41 = vld [vmem:[%s5469_s1 + $0x28] sm:$0xf0]  ;;  %v4285_v43 = vpack.c.bf16 %v338_v33, %v338_v33  ;;  %v2582_v44 = vor.u32 %v3482_v36, %v2579_v37 }
  0x3c   : > { %997 = vmatpush.bf16.msrb.mxu0 %v2794_v59  ;;  %v2825_v45 = vld [vmem:[%s5469_s1 + $0x2a0] sm:$0xf]  ;;  %v3545_v46 = vld [vmem:[%s5469_s1 + $0x2a4] sm:$0xf0]  ;;  %v2762_v47 = vor.u32 %v3529_v39, %v2761_v38  ;;  %v2510_v48 = vor.u32 %v3464_v40, %v2507_v41  ;;  %v3480_v49 = vld [vmem:[%s5469_s1 + $0xa4] sm:$0xf] }
  0x3d   : > { %1048 = vmatpush.bf16.msra.mxu2 %v2614_v54  ;;  %v2571_v50 = vld [vmem:[%s5469_s1 + $0xa8] sm:$0xf0]  ;;  %v2753_v52 = vld [vmem:[%s5469_s1 + $0x210] sm:$0xf]  ;;  %v3527_v53 = vld [vmem:[%s5469_s1 + $0x214] sm:$0xf0]  ;;  %v2826_v56 = vor.u32 %v3545_v46, %v2825_v45 }
  0x3e   : > { %1036 = vmatpush.bf16.msrb.mxu3 %v2542_v60  ;;  %v3462_v54 = vld [vmem:[%s5469_s1 + $0x14] sm:$0xf]  ;;  %v2499_v55 = vld [vmem:[%s5469_s1 + $0x18] sm:$0xf0]  ;;  %v2574_v58 = vor.u32 %v3480_v49, %v2571_v50  ;;  %v2817_v59 = vld [vmem:[%s5469_s1 + $0x290] sm:$0xf]  ;;  %v2754_v62 = vor.u32 %v3527_v53, %v2753_v52 }
  0x3f   : > { %1010 = vmatpush.bf16.msrb.mxu1 %v2858_v5  ;;  %v3543_v60 = vld [vmem:[%s5469_s1 + $0x294] sm:$0xf0]  ;;  %v3478_v61 = vld [vmem:[%s5469_s1 + $0x94] sm:$0xf]  ;;  %v2502_v63 = vor.u32 %v3462_v54, %v2499_v55  ;;  %v2563_v0 = vld [vmem:[%s5469_s1 + $0x98] sm:$0xf0] }
  0x40   : > { %998 = vmatpush.bf16.msrb.mxu0 %v2786_v9  ;;  %v2745_v1 = vld [vmem:[%s5469_s1 + $0x200] sm:$0xf]  ;;  %v3525_v2 = vld [vmem:[%s5469_s1 + $0x204] sm:$0xf0]  ;;  %v3460_v5 = vld [vmem:[%s5469_s1 + $0x4] sm:$0xf]  ;;  %v2818_v8 = vor.u32 %v3543_v60, %v2817_v59  ;;  %v2566_v12 = vor.u32 %v3478_v61, %v2563_v0 }
  0x41   : > { %1049 = vmatpush.bf16.msra.mxu2 %v2606_v6  ;;  %v2491_v6 = vld [vmem:[%s5469_s1 + $0x8] sm:$0xf0]  ;;  %v3506_v7 = vld [vmem:[%s5469_s1 + $0x174] sm:$0xf]  ;;  %v2675_v9 = vld [vmem:[%s5469_s1 + $0x178] sm:$0xf0]  ;;  %v2746_v16 = vor.u32 %v3525_v2, %v2745_v1 }
  0x42   : > { %1037 = vmatpush.bf16.msrb.mxu3 %v2534_v10  ;;  %v3538_v10 = vld [vmem:[%s5469_s1 + $0x274] sm:$0xf]  ;;  %v2803_v11 = vld [vmem:[%s5469_s1 + $0x278] sm:$0xf0]  ;;  %v2809_v13 = vld [vmem:[%s5469_s1 + $0x280] sm:$0xf] }
  0x43   : > { %1011 = vmatpush.bf16.msrb.mxu1 %v2850_v17  ;;  %v3541_v14 = vld [vmem:[%s5469_s1 + $0x284] sm:$0xf0]  ;;  %v336_v15 = vld [vmem:[%s4149_s23 + $0x20] sm:$0xff]  ;;  %v2494_v17 = vor.u32 %v3460_v5, %v2491_v6  ;;  %v2555_v19 = vld [vmem:[%s5469_s1 + $0x88] sm:$0xf0]  ;;  %s2420_s16 = sshll.u32 %s5421_s25, 4  ;;  %s2421_s16 = int_to_ptr.vmem [resolvable:$true] %s2420_s16 }
  0x44   : > { %999 = vmatpush.bf16.msrb.mxu0 %v2778_v21  ;;  %v3522_v20 = vld [vmem:[%s5469_s1 + $0x1f4] sm:$0xf]  ;;  %v2678_v21 = vor.u32 %v3506_v7, %v2675_v9  ;;  %v2739_v23 = vld [vmem:[%s5469_s1 + $0x1f8] sm:$0xf0]  ;;  %v2810_v26 = vor.u32 %v3541_v14, %v2809_v13  ;;  %v337_v27 = vld [vmem:[%s4149_s23 + $0x28] sm:$0xff]  ;;  %s3704_s23 = smul.u32 56, %s3904_s13 }
  0x45   : > { %1050 = vmatpush.bf16.msra.mxu2 %v2598_v18  ;;  %v3476_v18 = vld [vmem:[%s5469_s1 + $0x84] sm:$0xf]  ;;  %v3554_v24 = vld [vmem:[%s5469_s1 + $0x2f4] sm:$0xf]  ;;  %v2867_v25 = vld [vmem:[%s5469_s1 + $0x2f8] sm:$0xf0]  ;;  %v4392_v37 = vpack.c.bf16 %v337_v27, %v337_v27 }
  0x46   : > { %1038 = vmatpush.bf16.msrb.mxu3 %v2526_v22  ;;  %v2806_v22 = vor.u32 %v3538_v10, %v2803_v11  ;;  %v3504_v28 = vld [vmem:[%s5469_s1 + $0x164] sm:$0xf]  ;;  %v2558_v31 = vor.u32 %v3476_v18, %v2555_v19  ;;  %v2795_v33 = vld [vmem:[%s5469_s1 + $0x268] sm:$0xf0]  ;;  %v2659_v45 = vld [vmem:[%s5469_s1 + $0x158] sm:$0xf0]  ;;  %s2418_s14 = scalar_lea.hbm %s5477_s9, %s3704_s23 }
  0x47   : > { %1012 = vmatpush.bf16.msrb.mxu1 %v2842_v29  ;;  %v2667_v29 = vld [vmem:[%s5469_s1 + $0x168] sm:$0xf0]  ;;  %v3536_v32 = vld [vmem:[%s5469_s1 + $0x264] sm:$0xf]  ;;  %v3534_v46 = vld [vmem:[%s5469_s1 + $0x254] sm:$0xf] }
  0x48   : > { %1000 = vmatpush.bf16.msrb.mxu0 %v2770_v34  ;;  %2879 = vmatmul.msk.bf16.vlgmr.msrb.gmra.mxu2 %vm940_vm0, %v4285_v43  ;;  %v2742_v34 = vor.u32 %v3522_v20, %v2739_v23  ;;  %v3520_v36 = vld [vmem:[%s5469_s1 + $0x1e4] sm:$0xf]  ;;  %v2670_v38 = vor.u32 %v3504_v28, %v2667_v29  ;;  %v2731_v39 = vld [vmem:[%s5469_s1 + $0x1e8] sm:$0xf0]  ;;  %v3518_v50 = vld [vmem:[%s5469_s1 + $0x1d4] sm:$0xf] }
  0x49   : > { %1051 = vmatpush.bf16.msra.mxu2 %v2590_v30  ;;  %v4381_v30 = vpack.c.bf16 %v336_v15, %v336_v15  ;;  %v3552_v40 = vld [vmem:[%s5469_s1 + $0x2e4] sm:$0xf]  ;;  %v2859_v41 = vld [vmem:[%s5469_s1 + $0x2e8] sm:$0xf0]  ;;  %v2723_v53 = vld [vmem:[%s5469_s1 + $0x1d8] sm:$0xf0] }
  0x4a   : > { %1039 = vmatpush.bf16.msrb.mxu3 %v2518_v35  ;;  %v2870_v35 = vor.u32 %v3554_v24, %v2867_v25  ;;  %v2862_v49 = vor.u32 %v3552_v40, %v2859_v41  ;;  %v3550_v54 = vld [vmem:[%s5469_s1 + $0x2d4] sm:$0xf]  ;;  %v2851_v55 = vld [vmem:[%s5469_s1 + $0x2d8] sm:$0xf0]  ;;  %v2651_v59 = vld [vmem:[%s5469_s1 + $0x148] sm:$0xf0] }
  0x4b   : > { %1013 = vmatpush.bf16.msrb.mxu1 %v2834_v42  ;;  %v2798_v42 = vor.u32 %v3536_v32, %v2795_v33  ;;  %v3532_v60 = vld [vmem:[%s5469_s1 + $0x244] sm:$0xf]  ;;  %v2779_v61 = vld [vmem:[%s5469_s1 + $0x248] sm:$0xf0]  ;;  %v3498_v6 = vld [vmem:[%s5469_s1 + $0x134] sm:$0xf] }
  0x4c   : > { %1001 = vmatpush.bf16.msrb.mxu0 %v2762_v47  ;;  %v2787_v47 = vld [vmem:[%s5469_s1 + $0x258] sm:$0xf0]  ;;  %v3516_v0 = vld [vmem:[%s5469_s1 + $0x1c4] sm:$0xf]  ;;  %v2715_v1 = vld [vmem:[%s5469_s1 + $0x1c8] sm:$0xf0]  ;;  %v2782_v5 = vor.u32 %v3532_v60, %v2779_v61 }
  0x4d   : > { %1052 = vmatpush.bf16.msra.mxu2 %v2582_v44  ;;  %v3502_v44 = vld [vmem:[%s5469_s1 + $0x154] sm:$0xf]  ;;  %v3548_v2 = vld [vmem:[%s5469_s1 + $0x2c4] sm:$0xf]  ;;  %v2643_v7 = vld [vmem:[%s5469_s1 + $0x138] sm:$0xf0]  ;;  %v2718_v10 = vor.u32 %v3516_v0, %v2715_v1 }
  0x4e   : > { %1040 = vmatpush.bf16.msrb.mxu3 %v2510_v48  ;;  %v2734_v48 = vor.u32 %v3520_v36, %v2731_v39  ;;  %v2662_v52 = vor.u32 %v3502_v44, %v2659_v45  ;;  %v2771_v9 = vld [vmem:[%s5469_s1 + $0x238] sm:$0xf0]  ;;  %v2646_v13 = vor.u32 %v3498_v6, %v2643_v7  ;;  %v3546_v15 = vld [vmem:[%s5469_s1 + $0x2b4] sm:$0xf]  ;;  %v3496_v18 = vld [vmem:[%s5469_s1 + $0x124] sm:$0xf] }
  0x4f   : > { %1014 = vmatpush.bf16.msrb.mxu1 %v2826_v56  ;;  %v2790_v56 = vor.u32 %v3534_v46, %v2787_v47  ;;  %v2707_v14 = vld [vmem:[%s5469_s1 + $0x1b8] sm:$0xf0]  ;;  %v2635_v19 = vld [vmem:[%s5469_s1 + $0x128] sm:$0xf0]  ;;  %v3528_v20 = vld [vmem:[%s5469_s1 + $0x224] sm:$0xf] }
  0x50   : > { %1002 = vmatpush.bf16.msrb.mxu0 %v2754_v62  ;;  %v2726_v62 = vor.u32 %v3518_v50, %v2723_v53  ;;  %v3512_v24 = vld [vmem:[%s5469_s1 + $0x1a4] sm:$0xf]  ;;  %v2638_v25 = vor.u32 %v3496_v18, %v2635_v19  ;;  %v2827_v28 = vld [vmem:[%s5469_s1 + $0x2a8] sm:$0xf0]  ;;  %v2627_v32 = vld [vmem:[%s5469_s1 + $0x118] sm:$0xf0] }
  0x51   : > { %1053 = vmatpush.bf16.msra.mxu2 %v2574_v58  ;;  %v3500_v58 = vld [vmem:[%s5469_s1 + $0x144] sm:$0xf]  ;;  %v3526_v33 = vld [vmem:[%s5469_s1 + $0x214] sm:$0xf]  ;;  %v2691_v40 = vld [vmem:[%s5469_s1 + $0x198] sm:$0xf0] }
  0x52   : > { %1041 = vmatpush.bf16.msrb.mxu3 %v2502_v63  ;;  %v2854_v63 = vor.u32 %v3550_v54, %v2851_v55  ;;  %v3544_v27 = vld [vmem:[%s5469_s1 + $0x2a4] sm:$0xf]  ;;  %v3542_v41 = vld [vmem:[%s5469_s1 + $0x294] sm:$0xf]  ;;  %v2619_v46 = vld [vmem:[%s5469_s1 + $0x108] sm:$0xf0] }
  0x53   : > { %1015 = vmatpush.bf16.msrb.mxu1 %v2818_v8  ;;  %v3530_v8 = vld [vmem:[%s5469_s1 + $0x234] sm:$0xf]  ;;  %v2830_v36 = vor.u32 %v3544_v27, %v2827_v28  ;;  %v3492_v45 = vld [vmem:[%s5469_s1 + $0x104] sm:$0xf]  ;;  %v2875_v50 = vld [vmem:[%s5469_s1 + $0x308] sm:$0xf0] }
  0x54   : > { %1003 = vmatpush.bf16.msrb.mxu0 %v2746_v16  ;;  %v2835_v16 = vld [vmem:[%s5469_s1 + $0x2b8] sm:$0xf0]  ;;  %v3524_v47 = vld [vmem:[%s5469_s1 + $0x204] sm:$0xf]  ;;  %v2622_v54 = vor.u32 %v3492_v45, %v2619_v46  ;;  %v2811_v60 = vld [vmem:[%s5469_s1 + $0x288] sm:$0xf0] }
  0x55   : > { %1054 = vmatpush.bf16.msra.mxu2 %v2566_v12  ;;  %v3514_v12 = vld [vmem:[%s5469_s1 + $0x1b4] sm:$0xf]  ;;  %v2838_v23 = vor.u32 %v3546_v15, %v2835_v16  ;;  %v3508_v55 = vld [vmem:[%s5469_s1 + $0x184] sm:$0xf]  ;;  %v3561_v28 = vld [vmem:[%s5471_s3 + $0x18] sm:$0xff]  ;;  %s2422_s26 = sshll.u32 %s2418_s14, 4  ;;  %s2423_s26 = int_to_ptr.hbm [resolvable:$true] %s2422_s26 }
  0x56   : > { %1042 = vmatpush.bf16.msrb.mxu3 %v2494_v17  ;;  %v2774_v17 = vor.u32 %v3530_v8, %v2771_v9  ;;  %v3564_v16 = vld [vmem:[%s5471_s3 + $0x30] sm:$0xff]  ;;  %s3783_s21 = sshra.s32 %s2423_s26, 4  ;;  %s3789_s24 = scalar_lea.hbm %s5477_s9, 112  ;;  %s3784_s21 = int_to_ptr.hbm [resolvable:$true] %s3783_s21 }
  0x57   : > { %1016 = vmatpush.bf16.msrb.mxu1 %v2810_v26  ;;  %1004 = vmatmul.bf16.vlgmr.msrb.gmra.mxu0 %v4381_v30  ;;  %v2699_v26 = vld [vmem:[%s5469_s1 + $0x1a8] sm:$0xf0]  ;;  %s3785_s13 = scalar_lea.hbm %s3784_s21, 56  ;;  %p3790_p0 = scmp.lt.s32.totalorder %s3784_s21, %s5477_s9 }
  0x58   : > { %1061 = vmatpush.bf16.msra.mxu0 %v2678_v21  ;;  %v2763_v21 = vld [vmem:[%s5469_s1 + $0x228] sm:$0xf0]  ;;  %p3786_p11 = scmp.ne.s32.totalorder %s3784_s21, %s3785_s13  ;;  %p3791_p1 = scmp.lt.s32.totalorder %s3789_s24, %s3785_s13 }
  0x59   : > { %1055 = vmatpush.bf16.msra.mxu2 %v2558_v31  ;;  %1043 = vmatmul.bf16.vlgmr.msrb.gmra.mxu3 %v4183_v57  ;;  %v2843_v57 = vld [vmem:[%s5469_s1 + $0x2c8] sm:$0xf0]  ;;  %v2766_v29 = vor.u32 %v3528_v20, %v2763_v21  ;;  %v3494_v31 = vld [vmem:[%s5469_s1 + $0x114] sm:$0xf] }
  0x5a   : > { %1087 = vmatpush.bf16.msra.mxu3 %v2806_v22  ;;  %1017 = vmatmul.bf16.vlgmr.msrb.gmra.mxu1 %v4392_v37  ;;  %v2846_v11 = vor.u32 %v3548_v2, %v2843_v57  ;;  %v2710_v22 = vor.u32 %v3514_v12, %v2707_v14  ;;  %v2630_v39 = vor.u32 %v3494_v31, %v2627_v32  ;;  %v3573_v12 = vld [vmem:[%s5471_s3 + $0x78] sm:$0xff]  ;;  %v3563_v20 = vld [vmem:[%s5471_s3 + $0x28] sm:$0xff]  ;;  %p3787_p12 = pnand %p3786_p11, %p3921_p5  ;;  %p3792_p2 = por %p3791_p1, %p3790_p0 }
  0x5b   : > { %1074 = vmatpush.bf16.msra.mxu1 %v2742_v34  ;;  %v2755_v34 = vld [vmem:[%s5469_s1 + $0x218] sm:$0xf0]  ;;  %v3571_v21 = vld [vmem:[%s5471_s3 + $0x68] sm:$0xff] }
  0x5c   : > { %1062 = vmatpush.bf16.msra.mxu0 %v2670_v38  ;;  %1056 = vmatmul.bf16.vlgmr.msra.gmra.mxu2 %v4206_v4  ;;  %v2654_v4 = vor.u32 %v3500_v58, %v2651_v59  ;;  %v3510_v38 = vld [vmem:[%s5469_s1 + $0x194] sm:$0xf]  ;;  %v2758_v44 = vor.u32 %v3526_v33, %v2755_v34  ;;  %v3540_v59 = vld [vmem:[%s5469_s1 + $0x284] sm:$0xf]  ;;  %p3788_p13 = pneg %p3787_p12 }
  0x5d   : > { %1100 = vmatpush.bf16.msrb.mxu2 %v2870_v35  ;;  %v2702_v35 = vor.u32 %v3512_v24, %v2699_v26  ;;  %v3562_v24 = vld [vmem:[%s5471_s3 + $0x20] sm:$0xff]  ;;  %v3560_v34 = vld [vmem:[%s5471_s3 + $0x10] sm:$0xff] }
  0x5e   : > { %1088 = vmatpush.bf16.msra.mxu3 %v2798_v42  ;;  %v2819_v42 = vld [vmem:[%s5469_s1 + $0x298] sm:$0xf0]  ;;  %p3793_p3 = pnand %p3792_p2, %p3788_p13 }
  0x5f   : > { %1075 = vmatpush.bf16.msra.mxu1 %v2734_v48  ;;  %v2747_v48 = vld [vmem:[%s5469_s1 + $0x208] sm:$0xf0]  ;;  %v2822_v53 = vor.u32 %v3542_v41, %v2819_v42 }
  0x60   : > { %1063 = vmatpush.bf16.msra.mxu0 %v2662_v52  ;;  %v2694_v52 = vor.u32 %v3510_v38, %v2691_v40  ;;  %v2750_v58 = vor.u32 %v3524_v47, %v2747_v48  ;;  %v3559_v41 = vld [vmem:[%s5471_s3 + $0x8] sm:$0xff] }
  0x61   : > { %1101 = vmatpush.bf16.msrb.mxu2 %v2862_v49  ;;  %v3556_v49 = vld [vmem:[%s5469_s1 + $0x304] sm:$0xf]  ;;  %v3567_v42 = vld [vmem:[%s5471_s3 + $0x48] sm:$0xff] }
  0x62   : > { %1089 = vmatpush.bf16.msra.mxu3 %v2790_v56  ;;  %v2683_v56 = vld [vmem:[%s5469_s1 + $0x188] sm:$0xf0]  ;;  %v2878_v61 = vor.u32 %v3556_v49, %v2875_v50  ;;  %v3558_v49 = vld [vmem:[%s5471_s3] sm:$0xff] }
  0x63   : > { %1076 = vmatpush.bf16.msra.mxu1 %v2726_v62  ;;  %v2686_v62 = vor.u32 %v3508_v55, %v2683_v56  ;;  %v3566_v50 = vld [vmem:[%s5471_s3 + $0x40] sm:$0xff] }
  0x64   : > { %1064 = vmatpush.bf16.msra.mxu0 %v2654_v4 }
  0x65   : > { %1102 = vmatpush.bf16.msrb.mxu2 %v2854_v63  ;;  %v2814_v63 = vor.u32 %v3540_v59, %v2811_v60 }
  0x66   : > { %1090 = vmatpush.bf16.msra.mxu3 %v2782_v5 }
  0x67   : > { %1077 = vmatpush.bf16.msra.mxu1 %v2718_v10 }
  0x68   : > { %1065 = vmatpush.bf16.msra.mxu0 %v2646_v13  ;;  %v444_v13 = vld [vmem:[%s5470_s2] sm:$0x3] }
  0x69   : > { %1103 = vmatpush.bf16.msrb.mxu2 %v2846_v11  ;;  %v446_v18 = vperm.slane %v444_v13, 0  ;;  %v447_v19 = vperm.slane %v444_v13, 1 }
  0x6a   : > { %1091 = vmatpush.bf16.msra.mxu3 %v2774_v17  ;;  %v3572_v17 = vld [vmem:[%s5471_s3 + $0x70] sm:$0xff] }
  0x6b   : > { %1078 = vmatpush.bf16.msra.mxu1 %v2710_v22 }
  0x6c   : > { %1066 = vmatpush.bf16.msra.mxu0 %v2638_v25  ;;  %v3570_v25 = vld [vmem:[%s5471_s3 + $0x60] sm:$0xff] }
  0x6d   : > { %1104 = vmatpush.bf16.msrb.mxu2 %v2838_v23 }
  0x6e   : > { %1092 = vmatpush.bf16.msra.mxu3 %v2766_v29  ;;  %v3569_v29 = vld [vmem:[%s5471_s3 + $0x58] sm:$0xff] }
  0x6f   : > { %1079 = vmatpush.bf16.msra.mxu1 %v2702_v35  ;;  %v3568_v35 = vld [vmem:[%s5471_s3 + $0x50] sm:$0xff] }
  0x70   : > { %1067 = vmatpush.bf16.msra.mxu0 %v2630_v39 }
  0x71   : > { %1105 = vmatpush.bf16.msrb.mxu2 %v2830_v36 }
  0x72   : > { %1093 = vmatpush.bf16.msra.mxu3 %v2758_v44 }
  0x73   : > { %1080 = vmatpush.bf16.msra.mxu1 %v2694_v52 }
  0x74   : > { %1068 = vmatpush.bf16.msra.mxu0 %v2622_v54 }
  0x75   : > { %1106 = vmatpush.bf16.msrb.mxu2 %v2822_v53 }
  0x76   : > { %1094 = vmatpush.bf16.msra.mxu3 %v2750_v58 }
  0x77   : > { %1081 = vmatpush.bf16.msra.mxu1 %v2686_v62  ;;  %1069 = vmatmul.bf16.vlgmr.msra.gmra.mxu0 %v4174_v51 }
  0x78   : > { %1120 = vmatpush.bf16.msrb.mxu0 %v2878_v61 }
  0x79   : > { %1095 = vmatmul.bf16.vlgmr.msra.gmra.mxu3 %v4381_v30  ;;  %1107 = vmatpush.bf16.msrb.mxu2 %v2814_v63 }
  0x7a   : > { %1082 = vmatmul.bf16.vlgmr.msra.gmra.mxu1 %v4204_v3  ;;  %1293 = vmatpush.bf16.msrb.mxu3 %v3573_v12 }
  0x7c   : > { %1108 = vmatmul.bf16.vlgmr.msrb.gmra.mxu2 %v4392_v37 }
  0x7e   : > { %1294 = vmatpush.bf16.msrb.mxu3 %v3572_v17 }
  0x82   : > { %1295 = vmatpush.bf16.msrb.mxu3 %v3571_v21  ;;  %v3587_v21 = vld [vmem:[%s5473_s5 + $0x64] sm:$0xf0] }
  0x86   : > { %1296 = vmatpush.bf16.msrb.mxu3 %v3570_v25 }
  0x87   : > { %2880 = vmatmul.msk.bf16.vlgmr.msrb.gmra.mxu0 %vm940_vm0, %v4285_v43  ;;  %v3565_v43 = vld [vmem:[%s5471_s3 + $0x38] sm:$0xff] }
  0x88   : > { %1280 = vmatpush.bf16.msrb.mxu1 %v3565_v43 }
  0x8a   : > { %1297 = vmatpush.bf16.msrb.mxu3 %v3569_v29 }
  0x8c   : > { %1281 = vmatpush.bf16.msrb.mxu1 %v3564_v16  ;;  %v3588_v16 = vld [vmem:[%s5473_s5 + $0x74] sm:$0xf] }
  0x8e   : > { %1298 = vmatpush.bf16.msrb.mxu3 %v3568_v35  ;;  %v3582_v35 = vld [vmem:[%s5473_s5 + $0x44] sm:$0xf] }
  0x90   : > { %1282 = vmatpush.bf16.msrb.mxu1 %v3563_v20  ;;  %v2995_v20 = vld [vmem:[%s5473_s5 + $0x60] sm:$0xf] }
  0x92   : > { %1299 = vmatpush.bf16.msrb.mxu3 %v3567_v42  ;;  %v3580_v42 = vld [vmem:[%s5473_s5 + $0x34] sm:$0xf] }
  0x94   : > { %1283 = vmatpush.bf16.msrb.mxu1 %v3562_v24  ;;  %v2997_v24 = vld [vmem:[%s5473_s5 + $0x68] sm:$0xf0] }
  0x96   : > { %1300 = vmatpush.bf16.msrb.mxu3 %v3566_v50 }
  0x98   : > { %1284 = vmatpush.bf16.msrb.mxu1 %v3561_v28  ;;  %v3584_v28 = vld [vmem:[%s5473_s5 + $0x54] sm:$0xf] }
  0x9c   : > { %1285 = vmatpush.bf16.msrb.mxu1 %v3560_v34  ;;  %v3583_v34 = vld [vmem:[%s5473_s5 + $0x44] sm:$0xf0] }
  0xa0   : > { %1286 = vmatpush.bf16.msrb.mxu1 %v3559_v41  ;;  %v3581_v41 = vld [vmem:[%s5473_s5 + $0x34] sm:$0xf0] }
  0xa4   : > { %1287 = vmatpush.bf16.msrb.mxu1 %v3558_v49  ;;  %v3578_v49 = vld [vmem:[%s5473_s5 + $0x24] sm:$0xf] }
  0xb4   : > { %v953_v0 = vpop.f32.mrf.mxu0 }
  0xb5   : > { %v954_v22 = vadd.f32 %v953_v0, %v446_v18  ;;  %v3005_v18 = vld [vmem:[%s5473_s5 + $0x78] sm:$0xf0] }
  0xb7   : > { %v966_v4 = vpop.f32.mrf.mxu1 }
  0xb8   : > { %v967_v26 = vadd.f32 %v966_v4, %v954_v22  ;;  %v3586_v22 = vld [vmem:[%s5473_s5 + $0x64] sm:$0xf] }
  0xb9   : > { %v3000_v25 = vor.u32 %v3586_v22, %v2997_v24  ;;  %v3632_v24 = vld [vmem:[%s5475_s7 + $0x154] sm:$0xf] }
  0xbb   : > { %v979_v1 = vpop.f32.mrf.mxu2 }
  0xbc   : > { %v992_v2 = vpop.f32.mrf.mxu3  ;;  %v955_v57 = vpop.f32.mrf.mxu0  ;;  %v980_v32 = vadd.f32 %v979_v1, %v967_v26  ;;  %v2987_v26 = vld [vmem:[%s5473_s5 + $0x50] sm:$0xf] }
  0xbe   : > { %v993_v38 = vadd.f32 %v992_v2, %v980_v32 }
  0xbf   : > { %v968_v5 = vpop.f32.mrf.mxu1 }
  0xc3   : > { %v981_v6 = vpop.f32.mrf.mxu2 }
  0xc4   : > { %v994_v7 = vpop.f32.mrf.mxu3 }
  0xcb   : > { %v4563_v8 = vpop.f32.mrf.mxu2 }
  0xd3   : > { %v1033_v30 = vpop.f32.mrf.mxu2 }
  0xd4   : > { %v1005_v51 = vpop.f32.mrf.mxu0 }
  0xd5   : > { %v1006_v44 = vadd.f32 %v1005_v51, %v993_v38  ;;  %v2981_v38 = vld [vmem:[%s5473_s5 + $0x48] sm:$0xf0] }
  0xd7   : > { %v1018_v9 = vpop.f32.mrf.mxu1 }
  0xd8   : > { %v1019_v52 = vadd.f32 %v1018_v9, %v1006_v44 }
  0xda   : > { %v1032_v56 = vadd.f32 %v4563_v8, %v1019_v52  ;;  %v2965_v52 = vld [vmem:[%s5473_s5 + $0x28] sm:$0xf0] }
  0xdc   : > { %v1007_v10 = vpop.f32.mrf.mxu0  ;;  %v1044_v11 = vpop.f32.mrf.mxu3 }
  0xdd   : > { %v1045_v23 = vadd.f32 %v1044_v11, %v447_v19  ;;  %v3008_v19 = vor.u32 %v3588_v16, %v3005_v18  ;;  %v3179_v16 = vld [vmem:[%s5475_s7 + $0x150] sm:$0xf] }
  0xdf   : > { %v1057_v3 = vpop.f32.mrf.mxu2  ;;  %v1020_v37 = vpop.f32.mrf.mxu1  ;;  %1434 = vmatpush.bf16.msra.mxu2 %v3008_v19  ;;  %v3635_v19 = vld [vmem:[%s5475_s7 + $0x168] sm:$0xf0] }
  0xe0   : > { %v1058_v31 = vadd.f32 %v1057_v3, %v1045_v23  ;;  %v2996_v23 = vor.u32 %v3587_v21, %v2995_v20  ;;  %v3403_v20 = vld [vmem:[%s5475_s7 + $0x310] sm:$0xf]  ;;  %v3691_v21 = vld [vmem:[%s5475_s7 + $0x328] sm:$0xf0]  ;;  %v3180_v22 = vor.u32 %v3635_v19, %v3179_v16  ;;  %v3604_v19 = vld [vmem:[%s5475_s7 + $0x74] sm:$0xf] }
  0xe1   : > { %v3291_v16 = vld [vmem:[%s5475_s7 + $0x230] sm:$0xf] }
  0xe3   : > { %1435 = vmatpush.bf16.msra.mxu2 %v3000_v25  ;;  %v3181_v25 = vld [vmem:[%s5475_s7 + $0x16c] sm:$0xf0] }
  0xe4   : > { %v1046_v15 = vpop.f32.mrf.mxu3 }
  0xe5   : > { %v3589_v15 = vld [vmem:[%s5473_s5 + $0x74] sm:$0xf0] }
  0xe7   : > { %v1059_v14 = vpop.f32.mrf.mxu2 }
  0xe8   : > { %v3003_v14 = vld [vmem:[%s5473_s5 + $0x70] sm:$0xf] }
  0xe9   : > { %v3004_v17 = vor.u32 %v3589_v15, %v3003_v14  ;;  %v3695_v14 = vld [vmem:[%s5475_s7 + $0x34c] sm:$0xf]  ;;  %v3433_v15 = vld [vmem:[%s5475_s7 + $0x364] sm:$0xf0] }
  0xea   : > { %v3436_v18 = vor.u32 %v3695_v14, %v3433_v15  ;;  %v3067_v14 = vld [vmem:[%s5475_s7 + $0x70] sm:$0xf]  ;;  %v3607_v15 = vld [vmem:[%s5475_s7 + $0x88] sm:$0xf0] }
  0xeb   : > { %1421 = vmatpush.bf16.msra.mxu0 %v3004_v17 }
  0xef   : > { %1422 = vmatpush.bf16.msra.mxu0 %v2996_v23  ;;  %v3404_v23 = vor.u32 %v3691_v21, %v3403_v20  ;;  %v3069_v20 = vld [vmem:[%s5475_s7 + $0x8c] sm:$0xf0] }
  0xf4   : > { %v1070_v27 = vpop.f32.mrf.mxu0 }
  0xf5   : > { %v1071_v36 = vadd.f32 %v1070_v27, %v1058_v31  ;;  %v3585_v27 = vld [vmem:[%s5473_s5 + $0x54] sm:$0xf0]  ;;  %v2989_v31 = vld [vmem:[%s5473_s5 + $0x58] sm:$0xf0] }
  0xf6   : > { %v2988_v29 = vor.u32 %v3585_v27, %v2987_v26  ;;  %v2992_v32 = vor.u32 %v3584_v28, %v2989_v31  ;;  %v3688_v26 = vld [vmem:[%s5475_s7 + $0x314] sm:$0xf]  ;;  %v3184_v28 = vor.u32 %v3632_v24, %v3181_v25  ;;  %v3151_v31 = vld [vmem:[%s5475_s7 + $0x118] sm:$0xf]  ;;  %v3293_v24 = vld [vmem:[%s5475_s7 + $0x24c] sm:$0xf0] }
  0xf7   : > { %v1083_v33 = vpop.f32.mrf.mxu1 }
  0xf8   : > { %v1084_v45 = vadd.f32 %v1083_v33, %v1071_v36  ;;  %1423 = vmatpush.bf16.msra.mxu0 %v2988_v29  ;;  %1436 = vmatpush.bf16.msra.mxu2 %v2992_v32  ;;  %v2979_v33 = vld [vmem:[%s5473_s5 + $0x40] sm:$0xf]  ;;  %v3405_v29 = vld [vmem:[%s5475_s7 + $0x32c] sm:$0xf0] }
  0xf9   : > { %v2980_v36 = vor.u32 %v3583_v34, %v2979_v33  ;;  %v3408_v33 = vor.u32 %v3688_v26, %v3405_v29  ;;  %v3628_v34 = vld [vmem:[%s5475_s7 + $0x130] sm:$0xf0]  ;;  %v3039_v26 = vld [vmem:[%s5475_s7 + $0x38] sm:$0xf] }
  0xfc   : > { %v1096_v39 = vpop.f32.mrf.mxu3  ;;  %v1072_v40 = vpop.f32.mrf.mxu0  ;;  %1424 = vmatpush.bf16.msra.mxu0 %v2980_v36  ;;  %v3684_v36 = vld [vmem:[%s5475_s7 + $0x2f0] sm:$0xf0] }
  0xfd   : > { %v1097_v47 = vadd.f32 %v1096_v39, %v1084_v45  ;;  %v2984_v39 = vor.u32 %v3582_v35, %v2981_v38  ;;  %v2971_v40 = vld [vmem:[%s5473_s5 + $0x30] sm:$0xf]  ;;  %v2973_v45 = vld [vmem:[%s5473_s5 + $0x38] sm:$0xf0]  ;;  %v3375_v35 = vld [vmem:[%s5475_s7 + $0x2d8] sm:$0xf] }
  0xfe   : > { %v2972_v44 = vor.u32 %v3581_v41, %v2971_v40  ;;  %v3625_v40 = vld [vmem:[%s5475_s7 + $0x11c] sm:$0xf]  ;;  %v3153_v41 = vld [vmem:[%s5475_s7 + $0x134] sm:$0xf0] }
  0xff   : > { %v1109_v46 = vpop.f32.mrf.mxu2  ;;  %v1085_v48 = vpop.f32.mrf.mxu1  ;;  %1437 = vmatpush.bf16.msra.mxu2 %v2984_v39  ;;  %v3152_v39 = vor.u32 %v3628_v34, %v3151_v31  ;;  %v3656_v31 = vld [vmem:[%s5475_s7 + $0x210] sm:$0xf0] }
 0x100   : > { %v1110_v53 = vadd.f32 %v1109_v46, %v1097_v47  ;;  %v2976_v46 = vor.u32 %v3580_v42, %v2973_v45  ;;  %1425 = vmatpush.bf16.msra.mxu0 %v2972_v44  ;;  %v2963_v47 = vld [vmem:[%s5473_s5 + $0x20] sm:$0xf]  ;;  %v3579_v48 = vld [vmem:[%s5473_s5 + $0x24] sm:$0xf0]  ;;  %v3681_v42 = vld [vmem:[%s5475_s7 + $0x2dc] sm:$0xf]  ;;  %v3376_v44 = vor.u32 %v3684_v36, %v3375_v35  ;;  %v3156_v45 = vor.u32 %v3625_v40, %v3153_v41 }
 0x101   : > { %v2964_v50 = vor.u32 %v3579_v48, %v2963_v47  ;;  %v3123_v47 = vld [vmem:[%s5475_s7 + $0xe0] sm:$0xf]  ;;  %v3621_v48 = vld [vmem:[%s5475_s7 + $0xf8] sm:$0xf0] }
 0x102   : > { %v3653_v36 = vld [vmem:[%s5475_s7 + $0x1fc] sm:$0xf]  ;;  %v3011_v40 = vld [vmem:[%s5475_s7] sm:$0xf] }
 0x103   : > { %1438 = vmatpush.bf16.msra.mxu2 %v2976_v46  ;;  %v3377_v46 = vld [vmem:[%s5475_s7 + $0x2f4] sm:$0xf0]  ;;  %v3593_v41 = vld [vmem:[%s5475_s7 + $0x18] sm:$0xf0] }
 0x104   : > { %v1098_v54 = vpop.f32.mrf.mxu3  ;;  %v1122_v55 = vpop.f32.mrf.mxu0  ;;  %1426 = vmatpush.bf16.msra.mxu0 %v2964_v50  ;;  %v3380_v50 = vor.u32 %v3681_v42, %v3377_v46  ;;  %v3235_v42 = vld [vmem:[%s5475_s7 + $0x1c0] sm:$0xf]  ;;  %v3590_v46 = vld [vmem:[%s5475_s7 + $0x4] sm:$0xf] }
 0x105   : > { %v1123_v58 = vadd.f32 %v1122_v55, %v1110_v53  ;;  %v2968_v53 = vor.u32 %v3578_v49, %v2965_v52  ;;  %v2955_v54 = vld [vmem:[%s5473_s5 + $0x10] sm:$0xf]  ;;  %v3577_v55 = vld [vmem:[%s5473_s5 + $0x14] sm:$0xf0]  ;;  %v3347_v52 = vld [vmem:[%s5475_s7 + $0x2a0] sm:$0xf] }
 0x107   : > { %v1111_v59 = vpop.f32.mrf.mxu2  ;;  %v1126_v60 = vpack.c.bf16 %v1123_v58, %v1032_v56  ;;  %1439 = vmatpush.bf16.msra.mxu2 %v2968_v53  ;;  %v3576_v56 = vld [vmem:[%s5473_s5 + $0x14] sm:$0xf]  ;;  %v2956_v58 = vor.u32 %v3577_v55, %v2955_v54  ;;  %v3677_v53 = vld [vmem:[%s5475_s7 + $0x2b8] sm:$0xf0]  ;;  %v3618_v54 = vld [vmem:[%s5475_s7 + $0xe4] sm:$0xf] }
 0x108   : > { %v2957_v59 = vld [vmem:[%s5473_s5 + $0x18] sm:$0xf0]  ;;  %v3125_v55 = vld [vmem:[%s5475_s7 + $0xfc] sm:$0xf0] }
 0x109   : > { %v1127_v61 = vunpack.c.l.bf16 %v1126_v60  ;;  %v1128_v62 = vunpack.c.h.bf16 %v1126_v60  ;;  %1427 = vmatpush.bf16.msra.mxu0 %v2956_v58  ;;  %v3349_v58 = vld [vmem:[%s5475_s7 + $0x2bc] sm:$0xf0] }
 0x10b   : > { %v1129_v63 = vmul.f32 0.5, %v1127_v61  ;;  %v1130_v0 = vmul.f32 0.5, %v1128_v62  ;;  %v2960_v61 = vor.u32 %v3576_v56, %v2957_v59  ;;  %v3744_v62 = vld [vmem:[%s5472_s4] ss:$0 sm:$0xff]  ;;  %v3674_v56 = vld [vmem:[%s5475_s7 + $0x2a4] sm:$0xf]  ;;  %v3124_v59 = vor.u32 %v3621_v48, %v3123_v47 }
 0x10c   : > { %v1124_v4 = vpop.f32.mrf.mxu0  ;;  %v3013_v47 = vld [vmem:[%s5475_s7 + $0x1c] sm:$0xf0] }
 0x10d   : > { %v1131_v1 = vpack.c.bf16 %v1130_v0, %v1129_v63  ;;  %1440 = vmatpush.bf16.msra.mxu2 %v2960_v61  ;;  %v2947_v63 = vld [vmem:[%s5473_s5] sm:$0xf]  ;;  %v3575_v0 = vld [vmem:[%s5473_s5 + $0x4] sm:$0xf0]  ;;  %v3574_v4 = vld [vmem:[%s5473_s5 + $0x4] sm:$0xf]  ;;  %v3128_v61 = vor.u32 %v3618_v54, %v3125_v55 }
 0x10e   : > { %v3643_v55 = vld [vmem:[%s5475_s7 + $0x1a8] sm:$0xf0] }
 0x10f   : > { %v1132_v2 = vunpack.c.l.bf16 %v1131_v1  ;;  %v1133_v57 = vunpack.c.h.bf16 %v1131_v1  ;;  %v2948_v1 = vor.u32 %v3575_v0, %v2947_v63  ;;  %v3614_v63 = vld [vmem:[%s5475_s7 + $0xc0] sm:$0xf0]  ;;  %v3319_v0 = vld [vmem:[%s5475_s7 + $0x268] sm:$0xf] }
 0x111   : > { %3745 = vtanh.f32 %v1132_v2  ;;  %v2949_v2 = vld [vmem:[%s5473_s5 + $0x8] sm:$0xf0]  ;;  %1428 = vmatpush.bf16.msra.mxu0 %v2948_v1  ;;  %v3670_v1 = vld [vmem:[%s5475_s7 + $0x280] sm:$0xf0] }
 0x112   : > { %3747 = vtanh.f32 %v1133_v57  ;;  %v2952_v57 = vor.u32 %v3574_v4, %v2949_v2  ;;  %v3352_v4 = vor.u32 %v3674_v56, %v3349_v58  ;;  %v3611_v2 = vld [vmem:[%s5475_s7 + $0xac] sm:$0xf]  ;;  %v3439_v56 = vld [vmem:[%s5475_s7 + $0x350] sm:$0xf] }
 0x113   : > { %v3699_v58 = vld [vmem:[%s5475_s7 + $0x368] sm:$0xf0] }
 0x114   : > { %1441 = vmatpush.bf16.msra.mxu2 %v2952_v57  ;;  %v3097_v57 = vld [vmem:[%s5475_s7 + $0xc4] sm:$0xf0] }
 0x117   : > { %v3746_v5 = vpop.eup %3745 }
 0x118   : > { %v3748_v6 = vpop.eup %3747  ;;  %2228 = vmatpush.bf16.msrb.mxu2 %v3436_v18  ;;  %v3663_v18 = vld [vmem:[%s5475_s7 + $0x248] sm:$0xf0] }
 0x119   : > { %v1136_v7 = vpack.c.bf16 %v3748_v6, %v3746_v5  ;;  %v3292_v21 = vor.u32 %v3663_v18, %v3291_v16  ;;  %v3161_v16 = vld [vmem:[%s5475_s7 + $0x13c] sm:$0xf0] }
 0x11b   : > { %v1137_v51 = vunpack.c.l.bf16 %v1136_v7  ;;  %v1138_v30 = vunpack.c.h.bf16 %v1136_v7 }
 0x11c   : > { %2229 = vmatpush.bf16.msrb.mxu2 %v3408_v33  ;;  %v3041_v33 = vld [vmem:[%s5475_s7 + $0x54] sm:$0xf0] }
 0x11d   : > { %v1139_v9 = vmul.f32 0.5, %v1137_v51  ;;  %v1140_v8 = vmul.f32 0.5, %v1138_v30  ;;  %v3207_v30 = vld [vmem:[%s5475_s7 + $0x188] sm:$0xf] }
 0x11f   : > { %v1141_v10 = vpack.c.bf16 %v1140_v8, %v1139_v9  ;;  %v3642_v9 = vld [vmem:[%s5475_s7 + $0x1a0] sm:$0xf0]  ;;  %v3431_v8 = vld [vmem:[%s5475_s7 + $0x348] sm:$0xf] }
 0x120   : > { %2230 = vmatpush.bf16.msrb.mxu2 %v3380_v50  ;;  %v3646_v50 = vld [vmem:[%s5475_s7 + $0x1c4] sm:$0xf] }
 0x121   : > { %v1142_v3 = vunpack.c.l.bf16 %v1141_v10  ;;  %v1143_v11 = vunpack.c.h.bf16 %v1141_v10 }
 0x123   : > { %v1144_v37 = vadd.f32 0.5, %v1142_v3  ;;  %v1145_v43 = vadd.f32 0.5, %v1143_v11  ;;  %v3208_v3 = vor.u32 %v3642_v9, %v3207_v30  ;;  %v3698_v11 = vld [vmem:[%s5475_s7 + $0x360] sm:$0xf0]  ;;  %v3100_v30 = vor.u32 %v3611_v2, %v3097_v57  ;;  %v3636_v2 = vld [vmem:[%s5475_s7 + $0x170] sm:$0xf0] }
 0x124   : > { %2231 = vmatpush.bf16.msrb.mxu2 %v3352_v4  ;;  %v3441_v4 = vld [vmem:[%s5475_s7 + $0x36c] sm:$0xf0] }
 0x125   : > { %v1146_v12 = vpack.c.bf16 %v1144_v37, %v1144_v37  ;;  %v1147_v13 = vpack.c.bf16 %v1145_v43, %v1145_v43  ;;  %v3639_v37 = vld [vmem:[%s5475_s7 + $0x18c] sm:$0xf]  ;;  %v3209_v43 = vld [vmem:[%s5475_s7 + $0x1a4] sm:$0xf0]  ;;  %2189 = vmatpush.bf16.msra.mxu1 %v3208_v3 }
 0x127   : > { %1288 = vmatmul.bf16.vlgmr.msrb.gmra.mxu1 %v1146_v12  ;;  %1301 = vmatmul.bf16.vlgmr.msrb.gmra.mxu3 %v1147_v13  ;;  %v3432_v12 = vor.u32 %v3698_v11, %v3431_v8  ;;  %v3212_v13 = vor.u32 %v3639_v37, %v3209_v43 }
 0x129   : > { %2202 = vmatpush.bf16.msra.mxu3 %v3432_v12  ;;  %2215 = vmatpush.bf16.msrb.mxu0 %v3212_v13 }
 0x12a   : > { %2190 = vmatpush.bf16.msra.mxu1 %v3180_v22  ;;  %v3072_v22 = vor.u32 %v3604_v19, %v3069_v20  ;;  %v3682_v19 = vld [vmem:[%s5475_s7 + $0x2e4] sm:$0xf]  ;;  %v3385_v20 = vld [vmem:[%s5475_s7 + $0x2fc] sm:$0xf0] }
 0x12d   : > { %2203 = vmatpush.bf16.msra.mxu3 %v3404_v23  ;;  %2216 = vmatpush.bf16.msrb.mxu0 %v3184_v28  ;;  %v3660_v23 = vld [vmem:[%s5475_s7 + $0x234] sm:$0xf]  ;;  %v3263_v28 = vld [vmem:[%s5475_s7 + $0x1f8] sm:$0xf] }
 0x12e   : > { %2191 = vmatpush.bf16.msra.mxu1 %v3152_v39  ;;  %v3296_v25 = vor.u32 %v3660_v23, %v3293_v24  ;;  %v3264_v34 = vor.u32 %v3656_v31, %v3263_v28  ;;  %v3622_v23 = vld [vmem:[%s5475_s7 + $0x100] sm:$0xf0]  ;;  %v3355_v24 = vld [vmem:[%s5475_s7 + $0x2a8] sm:$0xf] }
 0x12f   : > { %v3133_v28 = vld [vmem:[%s5475_s7 + $0x104] sm:$0xf0] }
 0x131   : > { %2204 = vmatpush.bf16.msra.mxu3 %v3376_v44  ;;  %2217 = vmatpush.bf16.msrb.mxu0 %v3156_v45  ;;  %v3012_v44 = vor.u32 %v3593_v41, %v3011_v40  ;;  %v3649_v45 = vld [vmem:[%s5475_s7 + $0x1d8] sm:$0xf0]  ;;  %v3671_v40 = vld [vmem:[%s5475_s7 + $0x288] sm:$0xf0]  ;;  %v3612_v41 = vld [vmem:[%s5475_s7 + $0xb4] sm:$0xf] }
 0x132   : > { %2192 = vmatpush.bf16.msra.mxu1 %v3124_v59  ;;  %v3236_v48 = vor.u32 %v3649_v45, %v3235_v42  ;;  %v3105_v42 = vld [vmem:[%s5475_s7 + $0xcc] sm:$0xf0] }
 0x133   : > { %v3108_v45 = vor.u32 %v3612_v41, %v3105_v42 }
 0x135   : > { %2218 = vmatpush.bf16.msrb.mxu0 %v3128_v61  ;;  %v3640_v61 = vld [vmem:[%s5475_s7 + $0x194] sm:$0xf] }
 0x139   : > { %2219 = vmatpush.bf16.msrb.mxu0 %v3100_v30 }
 0x13d   : > { %2220 = vmatpush.bf16.msrb.mxu0 %v3072_v22  ;;  %v3131_v22 = vld [vmem:[%s5475_s7 + $0xe8] sm:$0xf] }
 0x1a4   : > { %v1289_v60 = vpop.f32.mrf.mxu1 }
 0x1a5   : > { %v1290_v5 = vadd.f32 %v3744_v62, %v1289_v60  ;;  %v3348_v60 = vor.u32 %v3677_v53, %v3347_v52  ;;  %v3095_v62 = vld [vmem:[%s5475_s7 + $0xa8] sm:$0xf]  ;;  %v3237_v52 = vld [vmem:[%s5475_s7 + $0x1dc] sm:$0xf0]  ;;  %v3215_v53 = vld [vmem:[%s5475_s7 + $0x190] sm:$0xf] }
 0x1a6   : > { %v3240_v54 = vor.u32 %v3646_v50, %v3237_v52  ;;  %v3216_v59 = vor.u32 %v3643_v55, %v3215_v53  ;;  %v3608_v50 = vld [vmem:[%s5475_s7 + $0x90] sm:$0xf0]  ;;  %v3299_v52 = vld [vmem:[%s5475_s7 + $0x238] sm:$0xf]  ;;  %v3605_v55 = vld [vmem:[%s5475_s7 + $0x7c] sm:$0xf] }
 0x1a7   : > { %2205 = vmatpush.bf16.msra.mxu3 %v3348_v60  ;;  %v3440_v60 = vor.u32 %v3699_v58, %v3439_v56  ;;  %v3077_v56 = vld [vmem:[%s5475_s7 + $0x94] sm:$0xf0] }
 0x1aa   : > { %v1302_v6 = vpop.f32.mrf.mxu3 }
 0x1ab   : > { %v1303_v7 = vadd.f32 %v1302_v6, %v1290_v5  ;;  %v3667_v5 = vld [vmem:[%s5475_s7 + $0x26c] sm:$0xf]  ;;  %v3321_v6 = vld [vmem:[%s5475_s7 + $0x284] sm:$0xf0] }
 0x1ac   : > { %v1291_v51 = vpop.f32.mrf.mxu1  ;;  %v3324_v8 = vor.u32 %v3667_v5, %v3321_v6  ;;  %v3411_v6 = vld [vmem:[%s5475_s7 + $0x318] sm:$0xf] }
 0x1ad   : > { %v1306_v10 = vpack.c.bf16 %v1303_v7, %v1303_v7  ;;  %v3096_v7 = vor.u32 %v3614_v63, %v3095_v62  ;;  %v3320_v51 = vor.u32 %v3670_v1, %v3319_v0  ;;  %v3217_v62 = vld [vmem:[%s5475_s7 + $0x1ac] sm:$0xf0]  ;;  %v3696_v63 = vld [vmem:[%s5475_s7 + $0x354] sm:$0xf]  ;;  %v3187_v1 = vld [vmem:[%s5475_s7 + $0x158] sm:$0xf] }
 0x1ae   : > { %2232 = vmatpush.bf16.msrb.mxu2 %v3324_v8  ;;  %v3220_v0 = vor.u32 %v3640_v61, %v3217_v62  ;;  %v3444_v57 = vor.u32 %v3696_v63, %v3441_v4  ;;  %v3188_v5 = vor.u32 %v3636_v2, %v3187_v1  ;;  %v3689_v8 = vld [vmem:[%s5475_s7 + $0x31c] sm:$0xf]  ;;  %v3301_v61 = vld [vmem:[%s5475_s7 + $0x254] sm:$0xf0]  ;;  %v1335_v62 = vld [vmem:[%s5474_s6] sm:$0x3] }
 0x1af   : > { %v1307_v17 = vunpack.c.l.bf16 %v1306_v10  ;;  %2193 = vmatpush.bf16.msra.mxu1 %v3096_v7  ;;  %2206 = vmatpush.bf16.msra.mxu3 %v3320_v51  ;;  %v3692_v7 = vld [vmem:[%s5475_s7 + $0x330] sm:$0xf0]  ;;  %v3633_v51 = vld [vmem:[%s5475_s7 + $0x15c] sm:$0xf]  ;;  %v3047_v4 = vld [vmem:[%s5475_s7 + $0x40] sm:$0xf] }
 0x1b0   : > { %v3412_v30 = vor.u32 %v3692_v7, %v3411_v6  ;;  %v3601_v1 = vld [vmem:[%s5475_s7 + $0x58] sm:$0xf0]  ;;  %v3271_v2 = vld [vmem:[%s5475_s7 + $0x200] sm:$0xf]  ;;  %v3598_v6 = vld [vmem:[%s5475_s7 + $0x44] sm:$0xf] }
 0x1b1   : > { %v1308_v27 = vmul.f32 0.5, %v1307_v17  ;;  %v3068_v17 = vor.u32 %v3607_v15, %v3067_v14  ;;  %v3685_v14 = vld [vmem:[%s5475_s7 + $0x2f8] sm:$0xf0]  ;;  %v3626_v15 = vld [vmem:[%s5475_s7 + $0x124] sm:$0xf] }
 0x1b2   : > { %v1304_v32 = vpop.f32.mrf.mxu3  ;;  %2233 = vmatpush.bf16.msrb.mxu2 %v3296_v25  ;;  %v3164_v18 = vor.u32 %v3626_v15, %v3161_v16  ;;  %v3132_v25 = vor.u32 %v3622_v23, %v3131_v22  ;;  %v3049_v7 = vld [vmem:[%s5475_s7 + $0x5c] sm:$0xf0]  ;;  %v3650_v15 = vld [vmem:[%s5475_s7 + $0x1e0] sm:$0xf0] }
 0x1b3   : > { %v1309_v38 = vpack.c.bf16 %v1308_v27, %v1308_v27  ;;  %2194 = vmatpush.bf16.msra.mxu1 %v3068_v17  ;;  %2207 = vmatpush.bf16.msra.mxu3 %v3292_v21  ;;  %v3600_v27 = vld [vmem:[%s5475_s7 + $0x50] sm:$0xf0]  ;;  %v3597_v32 = vld [vmem:[%s5475_s7 + $0x3c] sm:$0xf]  ;;  %v3388_v21 = vor.u32 %v3682_v19, %v3385_v20  ;;  %v3591_v19 = vld [vmem:[%s5475_s7 + $0xc] sm:$0xf] }
 0x1b4   : > { %v3040_v29 = vor.u32 %v3600_v27, %v3039_v26  ;;  %v3044_v35 = vor.u32 %v3597_v32, %v3041_v33  ;;  %v3678_v26 = vld [vmem:[%s5475_s7 + $0x2c0] sm:$0xf0]  ;;  %v3619_v27 = vld [vmem:[%s5475_s7 + $0xec] sm:$0xf]  ;;  %v3357_v33 = vld [vmem:[%s5475_s7 + $0x2c4] sm:$0xf0] }
 0x1b5   : > { %v1310_v49 = vunpack.c.l.bf16 %v1309_v38  ;;  %v3265_v38 = vld [vmem:[%s5475_s7 + $0x214] sm:$0xf0]  ;;  %v3136_v31 = vor.u32 %v3619_v27, %v3133_v28  ;;  %v3675_v32 = vld [vmem:[%s5475_s7 + $0x2ac] sm:$0xf]  ;;  %v3021_v20 = vld [vmem:[%s5475_s7 + $0x24] sm:$0xf0] }
 0x1b6   : > { %v3268_v39 = vor.u32 %v3653_v36, %v3265_v38  ;;  %2221 = vmatpush.bf16.msrb.mxu0 %v3044_v35  ;;  %v3103_v35 = vld [vmem:[%s5475_s7 + $0xb0] sm:$0xf]  ;;  %v3615_v36 = vld [vmem:[%s5475_s7 + $0xc8] sm:$0xf0]  ;;  %v3024_v23 = vor.u32 %v3591_v19, %v3021_v20 }
 0x1b7   : > { %3749 = vtanh.f32 %v1310_v49  ;;  %2195 = vmatpush.bf16.msra.mxu1 %v3040_v29  ;;  %2208 = vmatpush.bf16.msra.mxu3 %v3264_v34  ;;  %v3016_v49 = vor.u32 %v3590_v46, %v3013_v47  ;;  %v3356_v29 = vor.u32 %v3678_v26, %v3355_v24  ;;  %v3360_v34 = vor.u32 %v3675_v32, %v3357_v33  ;;  %v3327_v38 = vld [vmem:[%s5475_s7 + $0x270] sm:$0xf]  ;;  %v3668_v46 = vld [vmem:[%s5475_s7 + $0x274] sm:$0xf]  ;;  %v3245_v24 = vld [vmem:[%s5475_s7 + $0x1e4] sm:$0xf0] }
 0x1b8   : > { %2234 = vmatpush.bf16.msrb.mxu2 %v3268_v39  ;;  %v3104_v39 = vor.u32 %v3615_v36, %v3103_v35  ;;  %v3329_v47 = vld [vmem:[%s5475_s7 + $0x28c] sm:$0xf0]  ;;  %v3623_v20 = vld [vmem:[%s5475_s7 + $0x108] sm:$0xf0] }
 0x1b9   : > { %v3139_v19 = vld [vmem:[%s5475_s7 + $0xf0] sm:$0xf] }
 0x1ba   : > { %2222 = vmatpush.bf16.msrb.mxu0 %v3016_v49  ;;  %v3075_v49 = vld [vmem:[%s5475_s7 + $0x78] sm:$0xf] }
 0x1bb   : > { %2196 = vmatpush.bf16.msra.mxu1 %v3012_v44  ;;  %2209 = vmatpush.bf16.msra.mxu3 %v3236_v48  ;;  %v3328_v44 = vor.u32 %v3671_v40, %v3327_v38  ;;  %v3332_v48 = vor.u32 %v3668_v46, %v3329_v47  ;;  %v3076_v53 = vor.u32 %v3608_v50, %v3075_v49  ;;  %v3644_v49 = vld [vmem:[%s5475_s7 + $0x1b0] sm:$0xf0]  ;;  %v3447_v50 = vld [vmem:[%s5475_s7 + $0x358] sm:$0xf] }
 0x1bc   : > { %2235 = vmatpush.bf16.msrb.mxu2 %v3240_v54  ;;  %v3664_v54 = vld [vmem:[%s5475_s7 + $0x250] sm:$0xf0] }
 0x1bd   : > { %v3750_v9 = vpop.eup %3749  ;;  %v3300_v58 = vor.u32 %v3664_v54, %v3299_v52  ;;  %v3700_v52 = vld [vmem:[%s5475_s7 + $0x370] sm:$0xf0]  ;;  %v3225_v54 = vld [vmem:[%s5475_s7 + $0x1b4] sm:$0xf0] }
 0x1be   : > { %v1312_v10 = vpack.c.bf16 %v3750_v9, %v3750_v9  ;;  %v3189_v9 = vld [vmem:[%s5475_s7 + $0x174] sm:$0xf0] }
 0x1bf   : > { %2241 = vmatpush.bf16.msrb.mxu1 %v3216_v59  ;;  %2254 = vmatpush.bf16.msrb.mxu3 %v3440_v60  ;;  %v3080_v59 = vor.u32 %v3605_v55, %v3077_v56  ;;  %v3661_v60 = vld [vmem:[%s5475_s7 + $0x23c] sm:$0xf] }
 0x1c0   : > { %v1313_v3 = vunpack.c.l.bf16 %v1312_v10  ;;  %v3413_v10 = vld [vmem:[%s5475_s7 + $0x334] sm:$0xf0] }
 0x1c2   : > { %v1314_v11 = vmul.f32 0.5, %v1313_v3  ;;  %v3192_v3 = vor.u32 %v3633_v51, %v3189_v9  ;;  %v1337_v51 = vperm.slane %v1335_v62, 0 }
 0x1c3   : > { %2242 = vmatpush.bf16.msrb.mxu1 %v3188_v5  ;;  %2255 = vmatpush.bf16.msrb.mxu3 %v3412_v30  ;;  %v3657_v5 = vld [vmem:[%s5475_s7 + $0x218] sm:$0xf0]  ;;  %v1338_v30 = vperm.slane %v1335_v62, 1 }
 0x1c4   : > { %v1315_v37 = vpack.c.bf16 %v1314_v11, %v1314_v11  ;;  %v3416_v11 = vor.u32 %v3689_v8, %v3413_v10  ;;  %v3272_v9 = vor.u32 %v3657_v5, %v3271_v2  ;;  %v3052_v8 = vor.u32 %v3598_v6, %v3049_v7  ;;  %v3654_v10 = vld [vmem:[%s5475_s7 + $0x204] sm:$0xf]  ;;  %v3693_v5 = vld [vmem:[%s5475_s7 + $0x338] sm:$0xf0]  ;;  %v3197_v7 = vld [vmem:[%s5475_s7 + $0x17c] sm:$0xf0] }
 0x1c5   : > { %v3634_v6 = vld [vmem:[%s5475_s7 + $0x164] sm:$0xf] }
 0x1c6   : > { %v1316_v43 = vunpack.c.l.bf16 %v1315_v37  ;;  %v3159_v37 = vld [vmem:[%s5475_s7 + $0x120] sm:$0xf] }
 0x1c8   : > { %v1317_v12 = vadd.f32 0.5, %v1316_v43  ;;  %v3629_v43 = vld [vmem:[%s5475_s7 + $0x138] sm:$0xf0] }
 0x1ca   : > { %v1318_v13 = vpack.c.bf16 %v1317_v12, %v1317_v12  ;;  %v3383_v12 = vld [vmem:[%s5475_s7 + $0x2e0] sm:$0xf] }
 0x1cb   : > { %v3384_v17 = vor.u32 %v3685_v14, %v3383_v12  ;;  %v3243_v12 = vld [vmem:[%s5475_s7 + $0x1c8] sm:$0xf] }
 0x1cc   : > { %1429 = vmatmul.bf16.vlgmr.msra.gmra.mxu0 %v1318_v13  ;;  %1442 = vmatmul.bf16.vlgmr.msra.gmra.mxu2 %v1318_v13  ;;  %v3160_v13 = vor.u32 %v3629_v43, %v3159_v37  ;;  %v3019_v37 = vld [vmem:[%s5475_s7 + $0x8] sm:$0xf]  ;;  %v3594_v43 = vld [vmem:[%s5475_s7 + $0x20] sm:$0xf0] }
 0x1cd   : > { %2267 = vmatpush.bf16.msra.mxu0 %v3220_v0  ;;  %2280 = vmatpush.bf16.msra.mxu2 %v3444_v57  ;;  %v3304_v0 = vor.u32 %v3661_v60, %v3301_v61  ;;  %v3048_v57 = vor.u32 %v3601_v1, %v3047_v4  ;;  %v3020_v14 = vor.u32 %v3594_v43, %v3019_v37  ;;  %v3637_v4 = vld [vmem:[%s5475_s7 + $0x178] sm:$0xf0]  ;;  %v3391_v43 = vld [vmem:[%s5475_s7 + $0x2e8] sm:$0xf] }
 0x1ce   : > { %2243 = vmatpush.bf16.msrb.mxu1 %v3160_v13  ;;  %2256 = vmatpush.bf16.msrb.mxu3 %v3384_v17 }
 0x1d1   : > { %2268 = vmatpush.bf16.msra.mxu0 %v3192_v3  ;;  %2281 = vmatpush.bf16.msra.mxu2 %v3416_v11  ;;  %v3273_v3 = vld [vmem:[%s5475_s7 + $0x21c] sm:$0xf0] }
 0x1d2   : > { %2244 = vmatpush.bf16.msrb.mxu1 %v3132_v25  ;;  %2257 = vmatpush.bf16.msrb.mxu3 %v3356_v29  ;;  %v3276_v11 = vor.u32 %v3654_v10, %v3273_v3  ;;  %v3167_v10 = vld [vmem:[%s5475_s7 + $0x128] sm:$0xf]  ;;  %v3630_v3 = vld [vmem:[%s5475_s7 + $0x140] sm:$0xf0] }
 0x1d5   : > { %2269 = vmatpush.bf16.msra.mxu0 %v3164_v18  ;;  %2282 = vmatpush.bf16.msra.mxu2 %v3388_v21  ;;  %v3244_v18 = vor.u32 %v3650_v15, %v3243_v12  ;;  %v3647_v21 = vld [vmem:[%s5475_s7 + $0x1cc] sm:$0xf]  ;;  %v3686_v12 = vld [vmem:[%s5475_s7 + $0x300] sm:$0xf0] }
 0x1d6   : > { %2245 = vmatpush.bf16.msrb.mxu1 %v3104_v39  ;;  %2258 = vmatpush.bf16.msrb.mxu3 %v3328_v44  ;;  %v3248_v26 = vor.u32 %v3647_v21, %v3245_v24  ;;  %v3683_v15 = vld [vmem:[%s5475_s7 + $0x2ec] sm:$0xf] }
 0x1d7   : > { %v3679_v24 = vld [vmem:[%s5475_s7 + $0x2c8] sm:$0xf0] }
 0x1d9   : > { %2270 = vmatpush.bf16.msra.mxu0 %v3136_v31  ;;  %2283 = vmatpush.bf16.msra.mxu2 %v3360_v34 }
 0x1da   : > { %2246 = vmatpush.bf16.msrb.mxu1 %v3076_v53  ;;  %2259 = vmatpush.bf16.msrb.mxu3 %v3300_v58  ;;  %v3641_v53 = vld [vmem:[%s5475_s7 + $0x19c] sm:$0xf] }
 0x1db   : > { %v3697_v58 = vld [vmem:[%s5475_s7 + $0x35c] sm:$0xf]  ;;  %v3228_v1 = vor.u32 %v3641_v53, %v3225_v54  ;;  %v3606_v53 = vld [vmem:[%s5475_s7 + $0x84] sm:$0xf]  ;;  %v3085_v54 = vld [vmem:[%s5475_s7 + $0x9c] sm:$0xf0] }
 0x1dd   : > { %2271 = vmatpush.bf16.msra.mxu0 %v3108_v45  ;;  %2284 = vmatpush.bf16.msra.mxu2 %v3332_v48  ;;  %v3223_v48 = vld [vmem:[%s5475_s7 + $0x198] sm:$0xf] }
 0x1de   : > { %2247 = vmatpush.bf16.msrb.mxu1 %v3048_v57  ;;  %2260 = vmatpush.bf16.msrb.mxu3 %v3272_v9  ;;  %v3224_v62 = vor.u32 %v3644_v49, %v3223_v48  ;;  %v3419_v57 = vld [vmem:[%s5475_s7 + $0x320] sm:$0xf] }
 0x1e1   : > { %2272 = vmatpush.bf16.msra.mxu0 %v3080_v59  ;;  %2285 = vmatpush.bf16.msra.mxu2 %v3304_v0  ;;  %v3449_v59 = vld [vmem:[%s5475_s7 + $0x374] sm:$0xf0]  ;;  %v3195_v0 = vld [vmem:[%s5475_s7 + $0x160] sm:$0xf] }
 0x1e2   : > { %2248 = vmatpush.bf16.msrb.mxu1 %v3020_v14  ;;  %2261 = vmatpush.bf16.msrb.mxu3 %v3244_v18  ;;  %v3452_v2 = vor.u32 %v3697_v58, %v3449_v59  ;;  %v3196_v9 = vor.u32 %v3637_v4, %v3195_v0  ;;  %v3169_v14 = vld [vmem:[%s5475_s7 + $0x144] sm:$0xf0]  ;;  %v3392_v18 = vor.u32 %v3686_v12, %v3391_v43  ;;  %v3592_v43 = vld [vmem:[%s5475_s7 + $0x14] sm:$0xf]  ;;  %v3029_v12 = vld [vmem:[%s5475_s7 + $0x2c] sm:$0xf0] }
 0x1e3   : > { %v3088_v0 = vor.u32 %v3606_v53, %v3085_v54  ;;  %v3091_v53 = vld [vmem:[%s5475_s7 + $0x88] sm:$0xf]  ;;  %v3610_v54 = vld [vmem:[%s5475_s7 + $0xa0] sm:$0xf0] }
 0x1e5   : > { %2273 = vmatpush.bf16.msra.mxu0 %v3052_v8  ;;  %2286 = vmatpush.bf16.msra.mxu2 %v3276_v11  ;;  %v3420_v8 = vor.u32 %v3693_v5, %v3419_v57  ;;  %v3200_v11 = vor.u32 %v3634_v6, %v3197_v7  ;;  %v3599_v57 = vld [vmem:[%s5475_s7 + $0x4c] sm:$0xf]  ;;  %v3057_v5 = vld [vmem:[%s5475_s7 + $0x64] sm:$0xf0] }
 0x1e6   : > { %v3655_v6 = vld [vmem:[%s5475_s7 + $0x20c] sm:$0xf]  ;;  %v3281_v7 = vld [vmem:[%s5475_s7 + $0x224] sm:$0xf0] }
 0x1e9   : > { %2274 = vmatpush.bf16.msra.mxu0 %v3024_v23  ;;  %2287 = vmatpush.bf16.msra.mxu2 %v3248_v26  ;;  %v3363_v23 = vld [vmem:[%s5475_s7 + $0x2b0] sm:$0xf] }
 0x1ea   : > { %v3141_v26 = vld [vmem:[%s5475_s7 + $0x10c] sm:$0xf0] }
 0x249   : > { %v1430_v63 = vpop.f32.mrf.mxu0 }
 0x24a   : > { %v1431_v16 = vadd.f32 %v1430_v63, %v1337_v51  ;;  %v3448_v63 = vor.u32 %v3700_v52, %v3447_v50  ;;  %v3690_v51 = vld [vmem:[%s5475_s7 + $0x324] sm:$0xf]  ;;  %v3307_v50 = vld [vmem:[%s5475_s7 + $0x240] sm:$0xf]  ;;  %v3665_v52 = vld [vmem:[%s5475_s7 + $0x258] sm:$0xf0] }
 0x24b   : > { %v3308_v59 = vor.u32 %v3665_v52, %v3307_v50 }
 0x24f   : > { %v1443_v13 = vpop.f32.mrf.mxu2 }
 0x250   : > { %v1444_v17 = vadd.f32 %v1443_v13, %v1338_v30  ;;  %v3421_v30 = vld [vmem:[%s5475_s7 + $0x33c] sm:$0xf0]  ;;  %v3627_v13 = vld [vmem:[%s5475_s7 + $0x12c] sm:$0xf] }
 0x251   : > { %v1432_v22 = vpop.f32.mrf.mxu0  ;;  %v3424_v37 = vor.u32 %v3690_v51, %v3421_v30  ;;  %v3172_v21 = vor.u32 %v3627_v13, %v3169_v14  ;;  %v3648_v13 = vld [vmem:[%s5475_s7 + $0x1d4] sm:$0xf]  ;;  %v3253_v14 = vld [vmem:[%s5475_s7 + $0x1ec] sm:$0xf0] }
 0x252   : > { %v1447_v25 = vpack.c.bf16 %v1444_v17, %v1431_v16  ;;  %v3393_v16 = vld [vmem:[%s5475_s7 + $0x304] sm:$0xf0]  ;;  %v3168_v17 = vor.u32 %v3630_v3, %v3167_v10  ;;  %v3251_v10 = vld [vmem:[%s5475_s7 + $0x1d0] sm:$0xf]  ;;  %v3060_v3 = vor.u32 %v3599_v57, %v3057_v5  ;;  %v3035_v57 = vld [vmem:[%s5475_s7 + $0x18] sm:$0xf] }
 0x253   : > { %v3396_v22 = vor.u32 %v3683_v15, %v3393_v16  ;;  %v3231_v15 = vld [vmem:[%s5475_s7 + $0x1a0] sm:$0xf]  ;;  %v3645_v16 = vld [vmem:[%s5475_s7 + $0x1b8] sm:$0xf0]  ;;  %v3596_v5 = vld [vmem:[%s5475_s7 + $0x30] sm:$0xf0] }
 0x254   : > { %v1448_v27 = vunpack.c.l.bf16 %v1447_v25  ;;  %v1449_v28 = vunpack.c.h.bf16 %v1447_v25  ;;  %v3620_v25 = vld [vmem:[%s5475_s7 + $0xf4] sm:$0xf] }
 0x256   : > { %v1450_v29 = vmul.f32 0.5, %v1448_v27  ;;  %v1451_v31 = vmul.f32 0.5, %v1449_v28  ;;  %v3676_v27 = vld [vmem:[%s5475_s7 + $0x2b4] sm:$0xf]  ;;  %v3365_v28 = vld [vmem:[%s5475_s7 + $0x2cc] sm:$0xf0] }
 0x257   : > { %v1445_v32 = vpop.f32.mrf.mxu2 }
 0x258   : > { %v1452_v33 = vpack.c.bf16 %v1451_v31, %v1450_v29  ;;  %v3140_v29 = vor.u32 %v3623_v20, %v3139_v19  ;;  %v3364_v31 = vor.u32 %v3679_v24, %v3363_v23  ;;  %v3111_v32 = vld [vmem:[%s5475_s7 + $0xb8] sm:$0xf]  ;;  %v3232_v23 = vor.u32 %v3645_v16, %v3231_v15 }
 0x25a   : > { %v1453_v34 = vunpack.c.l.bf16 %v1452_v33  ;;  %v1454_v35 = vunpack.c.h.bf16 %v1452_v33  ;;  %v3616_v33 = vld [vmem:[%s5475_s7 + $0xd0] sm:$0xf0] }
 0x25c   : > { %3751 = vtanh.f32 %v1453_v34  ;;  %v3144_v34 = vor.u32 %v3620_v25, %v3141_v26  ;;  %v3203_v25 = vld [vmem:[%s5475_s7 + $0x168] sm:$0xf]  ;;  %v3638_v26 = vld [vmem:[%s5475_s7 + $0x180] sm:$0xf0] }
 0x25d   : > { %3753 = vtanh.f32 %v1454_v35  ;;  %v3368_v35 = vor.u32 %v3676_v27, %v3365_v28  ;;  %v3427_v27 = vld [vmem:[%s5475_s7 + $0x328] sm:$0xf]  ;;  %v3694_v28 = vld [vmem:[%s5475_s7 + $0x340] sm:$0xf0] }
 0x262   : > { %v3752_v36 = vpop.eup %3751 }
 0x263   : > { %v3754_v38 = vpop.eup %3753 }
 0x264   : > { %v1457_v39 = vpack.c.bf16 %v3754_v38, %v3752_v36  ;;  %v3335_v36 = vld [vmem:[%s5475_s7 + $0x278] sm:$0xf]  ;;  %v3672_v38 = vld [vmem:[%s5475_s7 + $0x290] sm:$0xf0] }
 0x266   : > { %v1458_v40 = vunpack.c.l.bf16 %v1457_v39  ;;  %v1459_v41 = vunpack.c.h.bf16 %v1457_v39  ;;  %v3613_v39 = vld [vmem:[%s5475_s7 + $0xbc] sm:$0xf] }
 0x268   : > { %v1460_v42 = vmul.f32 0.5, %v1458_v40  ;;  %v1461_v44 = vmul.f32 0.5, %v1459_v41  ;;  %v3113_v40 = vld [vmem:[%s5475_s7 + $0xd4] sm:$0xf0]  ;;  %v3669_v41 = vld [vmem:[%s5475_s7 + $0x27c] sm:$0xf] }
 0x269   : > { %v3116_v48 = vor.u32 %v3613_v39, %v3113_v40  ;;  %v3147_v39 = vld [vmem:[%s5475_s7 + $0xf8] sm:$0xf]  ;;  %v3624_v40 = vld [vmem:[%s5475_s7 + $0x110] sm:$0xf0] }
 0x26a   : > { %v1462_v45 = vpack.c.bf16 %v1461_v44, %v1460_v42  ;;  %v3337_v42 = vld [vmem:[%s5475_s7 + $0x294] sm:$0xf0]  ;;  %v3112_v44 = vor.u32 %v3616_v33, %v3111_v32  ;;  %v3175_v32 = vld [vmem:[%s5475_s7 + $0x130] sm:$0xf]  ;;  %v3631_v33 = vld [vmem:[%s5475_s7 + $0x148] sm:$0xf0] }
 0x26b   : > { %v3340_v49 = vor.u32 %v3669_v41, %v3337_v42  ;;  %v3371_v41 = vld [vmem:[%s5475_s7 + $0x2b8] sm:$0xf]  ;;  %v3680_v42 = vld [vmem:[%s5475_s7 + $0x2d0] sm:$0xf0] }
 0x26c   : > { %v1463_v46 = vunpack.c.l.bf16 %v1462_v45  ;;  %v1464_v47 = vunpack.c.h.bf16 %v1462_v45  ;;  %v3336_v45 = vor.u32 %v3672_v38, %v3335_v36  ;;  %v3176_v36 = vor.u32 %v3631_v33, %v3175_v32 }
 0x26e   : > { %v1465_v55 = vadd.f32 0.5, %v1463_v46  ;;  %v1466_v56 = vadd.f32 0.5, %v1464_v47  ;;  %v3083_v46 = vld [vmem:[%s5475_s7 + $0x80] sm:$0xf]  ;;  %v3609_v47 = vld [vmem:[%s5475_s7 + $0x98] sm:$0xf0] }
 0x26f   : > { %v3084_v58 = vor.u32 %v3609_v47, %v3083_v46  ;;  %v3119_v46 = vld [vmem:[%s5475_s7 + $0xc0] sm:$0xf]  ;;  %v3617_v47 = vld [vmem:[%s5475_s7 + $0xd8] sm:$0xf0] }
 0x270   : > { %v5127_v60 = vpack.c.bf16 %v1465_v55, %v1465_v55  ;;  %v5129_v61 = vpack.c.bf16 %v1466_v56, %v1466_v56  ;;  %v3662_v55 = vld [vmem:[%s5475_s7 + $0x244] sm:$0xf]  ;;  %v3309_v56 = vld [vmem:[%s5475_s7 + $0x25c] sm:$0xf0]  ;;  %v3120_v50 = vor.u32 %v3617_v47, %v3119_v46 }
 0x271   : > { %v3312_v4 = vor.u32 %v3662_v55, %v3309_v56  ;;  %v3315_v55 = vld [vmem:[%s5475_s7 + $0x248] sm:$0xf]  ;;  %v3666_v56 = vld [vmem:[%s5475_s7 + $0x260] sm:$0xf0] }
 0x272   : > { %2197 = vmatmul.bf16.vlgmr.msra.gmra.mxu1 %v5127_v60  ;;  %2210 = vmatmul.bf16.vlgmr.msra.gmra.mxu3 %v5129_v61 }
 0x273   : > { %2223 = vmatmul.bf16.vlgmr.msrb.gmra.mxu0 %v5127_v60  ;;  %2236 = vmatmul.bf16.vlgmr.msrb.gmra.mxu2 %v5129_v61 }
 0x274   : > { %2293 = vmatpush.bf16.msra.mxu1 %v3224_v62  ;;  %2306 = vmatpush.bf16.msra.mxu3 %v3448_v63  ;;  %v3055_v62 = vld [vmem:[%s5475_s7 + $0x48] sm:$0xf]  ;;  %v3602_v63 = vld [vmem:[%s5475_s7 + $0x60] sm:$0xf0] }
 0x275   : > { %2319 = vmatpush.bf16.msrb.mxu0 %v3228_v1  ;;  %2332 = vmatpush.bf16.msrb.mxu2 %v3452_v2  ;;  %v3279_v1 = vld [vmem:[%s5475_s7 + $0x208] sm:$0xf]  ;;  %v3658_v2 = vld [vmem:[%s5475_s7 + $0x220] sm:$0xf0]  ;;  %v3056_v51 = vor.u32 %v3602_v63, %v3055_v62  ;;  %v3063_v62 = vld [vmem:[%s5475_s7 + $0x50] sm:$0xf] }
 0x276   : > { %v3280_v30 = vor.u32 %v3658_v2, %v3279_v1  ;;  %v3603_v63 = vld [vmem:[%s5475_s7 + $0x68] sm:$0xf0] }
 0x277   : > { %v3064_v1 = vor.u32 %v3603_v63, %v3063_v62 }
 0x278   : > { %2294 = vmatpush.bf16.msra.mxu1 %v3196_v9  ;;  %2307 = vmatpush.bf16.msra.mxu3 %v3420_v8  ;;  %v3027_v9 = vld [vmem:[%s5475_s7 + $0x10] sm:$0xf]  ;;  %v3595_v8 = vld [vmem:[%s5475_s7 + $0x28] sm:$0xf0] }
 0x279   : > { %2320 = vmatpush.bf16.msrb.mxu0 %v3200_v11  ;;  %2333 = vmatpush.bf16.msrb.mxu2 %v3424_v37  ;;  %v3284_v11 = vor.u32 %v3655_v6, %v3281_v7  ;;  %v3651_v37 = vld [vmem:[%s5475_s7 + $0x1e8] sm:$0xf0]  ;;  %v3028_v19 = vor.u32 %v3595_v8, %v3027_v9  ;;  %v3259_v6 = vld [vmem:[%s5475_s7 + $0x1d8] sm:$0xf]  ;;  %v3652_v7 = vld [vmem:[%s5475_s7 + $0x1f0] sm:$0xf0] }
 0x27a   : > { %v3252_v20 = vor.u32 %v3651_v37, %v3251_v10  ;;  %v5412_v9 = vld [vmem:[%s5476_s8] sm:$0x7f] }
 0x27b   : > { %v1599_v10 = vperm.slane %v5412_v9, 0 }
 0x27c   : > { %2295 = vmatpush.bf16.msra.mxu1 %v3168_v17  ;;  %2308 = vmatpush.bf16.msra.mxu3 %v3392_v18  ;;  %v3455_v17 = vld [vmem:[%s5475_s7 + $0x360] sm:$0xf]  ;;  %v3701_v18 = vld [vmem:[%s5475_s7 + $0x378] sm:$0xf0] }
 0x27d   : > { %2321 = vmatpush.bf16.msrb.mxu0 %v3172_v21  ;;  %2334 = vmatpush.bf16.msrb.mxu2 %v3396_v22  ;;  %v3032_v21 = vor.u32 %v3592_v43, %v3029_v12  ;;  %v3256_v22 = vor.u32 %v3648_v13, %v3253_v14  ;;  %v3456_v24 = vor.u32 %v3701_v18, %v3455_v17 }
 0x280   : > { %2296 = vmatpush.bf16.msra.mxu1 %v3140_v29  ;;  %2309 = vmatpush.bf16.msra.mxu3 %v3364_v31  ;;  %v3204_v29 = vor.u32 %v3638_v26, %v3203_v25  ;;  %v3428_v31 = vor.u32 %v3694_v28, %v3427_v27  ;;  %v1602_v26 = vperm.slane %v5412_v9, 3 }
 0x281   : > { %2322 = vmatpush.bf16.msrb.mxu0 %v3144_v34  ;;  %2335 = vmatpush.bf16.msrb.mxu2 %v3368_v35  ;;  %v3399_v34 = vld [vmem:[%s5475_s7 + $0x2f0] sm:$0xf]  ;;  %v3687_v35 = vld [vmem:[%s5475_s7 + $0x308] sm:$0xf0] }
 0x282   : > { %2249 = vmatmul.bf16.vlgmr.msrb.gmra.mxu1 %v5127_v60  ;;  %2262 = vmatmul.bf16.vlgmr.msrb.gmra.mxu3 %v5129_v61  ;;  %v3400_v38 = vor.u32 %v3687_v35, %v3399_v34 }
 0x283   : > { %2275 = vmatmul.bf16.vlgmr.msra.gmra.mxu0 %v5127_v60  ;;  %2288 = vmatmul.bf16.vlgmr.msra.gmra.mxu2 %v5129_v61 }
 0x284   : > { %2297 = vmatpush.bf16.msra.mxu1 %v3112_v44  ;;  %2310 = vmatpush.bf16.msra.mxu3 %v3336_v45  ;;  %v3148_v44 = vor.u32 %v3624_v40, %v3147_v39  ;;  %v3372_v45 = vor.u32 %v3680_v42, %v3371_v41 }
 0x285   : > { %2323 = vmatpush.bf16.msrb.mxu0 %v3116_v48  ;;  %2336 = vmatpush.bf16.msrb.mxu2 %v3340_v49  ;;  %v3343_v48 = vld [vmem:[%s5475_s7 + $0x280] sm:$0xf]  ;;  %v3673_v49 = vld [vmem:[%s5475_s7 + $0x298] sm:$0xf0] }
 0x286   : > { %v3344_v52 = vor.u32 %v3673_v49, %v3343_v48  ;;  %v1603_v49 = vperm.slane %v5412_v9, 4 }
 0x288   : > { %2298 = vmatpush.bf16.msra.mxu1 %v3084_v58  ;;  %2311 = vmatpush.bf16.msra.mxu3 %v3308_v59  ;;  %v3092_v58 = vor.u32 %v3610_v54, %v3091_v53  ;;  %v3316_v59 = vor.u32 %v3666_v56, %v3315_v55  ;;  %v1604_v53 = vperm.slane %v5412_v9, 5 }
 0x289   : > { %2324 = vmatpush.bf16.msrb.mxu0 %v3088_v0  ;;  %2337 = vmatpush.bf16.msrb.mxu2 %v3312_v4  ;;  %v3287_v0 = vld [vmem:[%s5475_s7 + $0x210] sm:$0xf]  ;;  %v3659_v4 = vld [vmem:[%s5475_s7 + $0x228] sm:$0xf0] }
 0x28a   : > { %v3288_v2 = vor.u32 %v3659_v4, %v3287_v0 }
 0x28c   : > { %2299 = vmatpush.bf16.msra.mxu1 %v3056_v51  ;;  %2312 = vmatpush.bf16.msra.mxu3 %v3280_v30  ;;  %v3036_v51 = vor.u32 %v3596_v5, %v3035_v57  ;;  %v3260_v30 = vor.u32 %v3652_v7, %v3259_v6 }
 0x28d   : > { %2325 = vmatpush.bf16.msrb.mxu0 %v3060_v3  ;;  %2338 = vmatpush.bf16.msrb.mxu2 %v3284_v11  ;;  %v1600_v11 = vperm.slane %v5412_v9, 1 }
 0x290   : > { %2300 = vmatpush.bf16.msra.mxu1 %v3028_v19  ;;  %2313 = vmatpush.bf16.msra.mxu3 %v3252_v20 }
 0x291   : > { %2326 = vmatpush.bf16.msrb.mxu0 %v3032_v21  ;;  %2339 = vmatpush.bf16.msrb.mxu2 %v3256_v22  ;;  %v1601_v22 = vperm.slane %v5412_v9, 2 }
 0x293   : > { %2301 = vmatmul.bf16.vlgmr.msra.gmra.mxu1 %v5127_v60  ;;  %2314 = vmatmul.bf16.vlgmr.msra.gmra.mxu3 %v5129_v61 }
 0x294   : > { %2345 = vmatpush.bf16.msrb.mxu1 %v3232_v23  ;;  %2358 = vmatpush.bf16.msrb.mxu3 %v3456_v24 }
 0x295   : > { %2327 = vmatmul.bf16.vlgmr.msrb.gmra.mxu0 %v5127_v60  ;;  %2340 = vmatmul.bf16.vlgmr.msrb.gmra.mxu2 %v5129_v61 }
 0x298   : > { %2346 = vmatpush.bf16.msrb.mxu1 %v3204_v29  ;;  %2359 = vmatpush.bf16.msrb.mxu3 %v3428_v31 }
 0x29c   : > { %2347 = vmatpush.bf16.msrb.mxu1 %v3176_v36  ;;  %2360 = vmatpush.bf16.msrb.mxu3 %v3400_v38 }
 0x2a0   : > { %2348 = vmatpush.bf16.msrb.mxu1 %v3148_v44  ;;  %2361 = vmatpush.bf16.msrb.mxu3 %v3372_v45 }
 0x2a4   : > { %2349 = vmatpush.bf16.msrb.mxu1 %v3120_v50  ;;  %2362 = vmatpush.bf16.msrb.mxu3 %v3344_v52 }
 0x2a8   : > { %2350 = vmatpush.bf16.msrb.mxu1 %v3092_v58  ;;  %2363 = vmatpush.bf16.msrb.mxu3 %v3316_v59 }
 0x2ac   : > { %2351 = vmatpush.bf16.msrb.mxu1 %v3064_v1  ;;  %2364 = vmatpush.bf16.msrb.mxu3 %v3288_v2 }
 0x2b0   : > { %2352 = vmatpush.bf16.msrb.mxu1 %v3036_v51  ;;  %2365 = vmatpush.bf16.msrb.mxu3 %v3260_v30 }
 0x2b3   : > { %2353 = vmatmul.bf16.vlgmr.msrb.gmra.mxu1 %v5127_v60  ;;  %2366 = vmatmul.bf16.vlgmr.msrb.gmra.mxu3 %v5129_v61 }
 0x2ef   : > { %v2198_v8 = vpop.f32.mrf.mxu1 }
 0x2f0   : > { %v2224_v3 = vpop.f32.mrf.mxu0  ;;  %v2199_v37 = vadd.f32 %v2198_v8, %v1599_v10 }
 0x2f1   : > { %v2225_v43 = vadd.f32 %v2224_v3, %v1600_v11 }
 0x2f5   : > { %v2211_v12 = vpop.f32.mrf.mxu3 }
 0x2f6   : > { %v2212_v13 = vadd.f32 %v2211_v12, %v2199_v37  ;;  %v2237_v60 = vpop.f32.mrf.mxu2  ;;  %v1605_v37 = vperm.slane %v5412_v9, 6 }
 0x2f7   : > { %v2238_v14 = vadd.f32 %v2237_v60, %v2225_v43  ;;  %v2200_v61 = vpop.f32.mrf.mxu1 }
 0x2f8   : > { %v2371_v15 = vmul.f32 0.5, %v2212_v13  ;;  %v2226_v16 = vpop.f32.mrf.mxu0 }
 0x2f9   : > { %v2372_v17 = vmul.f32 0.5, %v2238_v14 }
 0x2fa   : > { %3755 = vtanh.f32 %v2371_v15 }
 0x2fb   : > { %3757 = vtanh.f32 %v2372_v17 }
 0x2fd   : > { %v2213_v18 = vpop.f32.mrf.mxu3 }
 0x2fe   : > { %v2239_v19 = vpop.f32.mrf.mxu2 }
 0x2ff   : > { %v2250_v20 = vpop.f32.mrf.mxu1 }
 0x300   : > { %v3756_v21 = vpop.eup %3755  ;;  %v2276_v23 = vpop.f32.mrf.mxu0  ;;  %v2251_v31 = vadd.f32 %v2250_v20, %v1601_v22 }
 0x301   : > { %v3758_v24 = vpop.eup %3757  ;;  %v2385_v25 = vmul.f32 0.5, %v3756_v21  ;;  %v2277_v32 = vadd.f32 %v2276_v23, %v1602_v26 }
 0x302   : > { %v2386_v27 = vmul.f32 0.5, %v3758_v24 }
 0x303   : > { %v2392_v28 = vadd.f32 0.5, %v2385_v25 }
 0x304   : > { %v2393_v29 = vadd.f32 0.5, %v2386_v27 }
 0x305   : > { %2399 = vst [vmem:[%s5421_s25] sm:$0xff] %v2392_v28  ;;  %v2263_v33 = vpop.f32.mrf.mxu3 }
 0x306   : > { %2400 = vst [vmem:[%s5421_s25 + $0x8] sm:$0xff] %v2393_v29  ;;  %v2264_v34 = vadd.f32 %v2263_v33, %v2251_v31  ;;  %v2289_v35 = vpop.f32.mrf.mxu2 }
 0x307   : > { %v2290_v36 = vadd.f32 %v2289_v35, %v2277_v32  ;;  %v2252_v38 = vpop.f32.mrf.mxu1 }
 0x308   : > { %v2373_v39 = vmul.f32 0.5, %v2264_v34  ;;  %v2278_v40 = vpop.f32.mrf.mxu0 }
 0x309   : > { %v2374_v41 = vmul.f32 0.5, %v2290_v36 }
 0x30a   : > { %3759 = vtanh.f32 %v2373_v39 }
 0x30b   : > { %3761 = vtanh.f32 %v2374_v41 }
 0x30d   : > { %v2265_v42 = vpop.f32.mrf.mxu3 }
 0x30e   : > { %v2291_v44 = vpop.f32.mrf.mxu2 }
 0x310   : > { %v3760_v45 = vpop.eup %3759  ;;  %v2302_v46 = vpop.f32.mrf.mxu1 }
 0x311   : > { %v3762_v47 = vpop.eup %3761  ;;  %v2387_v48 = vmul.f32 0.5, %v3760_v45  ;;  %v2303_v56 = vadd.f32 %v2302_v46, %v1603_v49 }
 0x312   : > { %v2328_v50 = vpop.f32.mrf.mxu0  ;;  %v2388_v52 = vmul.f32 0.5, %v3762_v47 }
 0x313   : > { %v2394_v54 = vadd.f32 0.5, %v2387_v48  ;;  %v2329_v58 = vadd.f32 %v2328_v50, %v1604_v53 }
 0x314   : > { %v2395_v55 = vadd.f32 0.5, %v2388_v52 }
 0x315   : > { %2401 = vst [vmem:[%s5421_s25 + $0x10] sm:$0xff] %v2394_v54 }
 0x316   : > { %2402 = vst [vmem:[%s5421_s25 + $0x18] sm:$0xff] %v2395_v55  ;;  %v2315_v59 = vpop.f32.mrf.mxu3 }
 0x317   : > { %v2316_v62 = vadd.f32 %v2315_v59, %v2303_v56 }
 0x318   : > { %v2341_v63 = vpop.f32.mrf.mxu2  ;;  %v2304_v4 = vpop.f32.mrf.mxu1 }
 0x319   : > { %v2342_v0 = vadd.f32 %v2341_v63, %v2329_v58  ;;  %v2375_v1 = vmul.f32 0.5, %v2316_v62 }
 0x31a   : > { %v2330_v2 = vpop.f32.mrf.mxu0 }
 0x31b   : > { %v2376_v57 = vmul.f32 0.5, %v2342_v0  ;;  %3763 = vtanh.f32 %v2375_v1 }
 0x31d   : > { %3765 = vtanh.f32 %v2376_v57 }
 0x31e   : > { %v2317_v5 = vpop.f32.mrf.mxu3 }
 0x320   : > { %v2343_v6 = vpop.f32.mrf.mxu2 }
 0x321   : > { %v3764_v7 = vpop.eup %3763 }
 0x322   : > { %v2389_v30 = vmul.f32 0.5, %v3764_v7 }
 0x323   : > { %v3766_v51 = vpop.eup %3765 }
 0x324   : > { %v2390_v8 = vmul.f32 0.5, %v3766_v51  ;;  %v2396_v10 = vadd.f32 0.5, %v2389_v30 }
 0x326   : > { %v2397_v3 = vadd.f32 0.5, %v2390_v8  ;;  %2403 = vst [vmem:[%s5421_s25 + $0x20] sm:$0xff] %v2396_v10 }
 0x328   : > { %2404 = vst [vmem:[%s5421_s25 + $0x28] sm:$0xff] %v2397_v3 }
 0x330   : > { %v2354_v11 = vpop.f32.mrf.mxu1 }
 0x331   : > { %v2355_v43 = vadd.f32 %v2354_v11, %v1605_v37 }
 0x336   : > { %v2367_v12 = vpop.f32.mrf.mxu3 }
 0x337   : > { %v2368_v13 = vadd.f32 %v2367_v12, %v2355_v43 }
 0x338   : > { %v2356_v60 = vpop.f32.mrf.mxu1 }
 0x339   : > { %v2377_v14 = vmul.f32 0.5, %v2368_v13 }
 0x33b   : > { %3767 = vtanh.f32 %v2377_v14 }
 0x33e   : > { %v2369_v61 = vpop.f32.mrf.mxu3 }
 0x341   : > { %v3768_v15 = vpop.eup %3767 }
 0x342   : > { %v2391_v16 = vmul.f32 0.5, %v3768_v15 }
 0x344   : > { %v2398_v9 = vadd.f32 0.5, %v2391_v16 }
 0x346   : > { %2405 = vst.msk [vmem:[%s5421_s25 + $0x30] sm:$0xff] %vm940_vm0, %v2398_v9 }
 0x347   : > { %3796 = shalt.err (!%p3793_p3)
}
 0x348   : > { %3705 = dma.vmem_to_hbm [thread:$0]  (%p3921_p5), %s2421_s16, 896, %s2423_s26, %s2407_s17  }
 0x349 PF: > { %p3711_p4 = scmp.ge.s32.totalorder %s3831_s12, 2  ;;  %s2434_s0 = sand.u32 1, %s3819_s30  }
 0x34a   : > { %s2435_s25 = scalar_lea.sflag [#allocation3], %s2434_s0 }
 0x34b   : > { %p3708_p7 = pnand %p3711_p4, %p3925_p6 }
 0x34d   : > { %p3709_p8 = pneg %p3708_p7 }
 0x34f   : > { %3814 = dma.done.wait (%p3709_p8), %s2435_s25, 896  }
 0x350   : > { %3816 = vsyncadd (%p3709_p8), %s2435_s25, 4294966400  ;;  %p19_p9 = scmp.ge.s32.totalorder %s3908_s15, 4   ;;  %s5482_s30 = smov %s3823_s10 }
 0x351   : > { %s5483_s10 = smov %s3827_s11  ;;  %s5484_s11 = smov %s3919_s18 }
 0x352   : > { %s5485_s12 = smov %s3908_s15  ;;  %21 = sbr.rel (!%p19_p9) target bundleno = 5 (0x5), region = 91 }
 0x357   :  { %2441 = vsyncpa [#allocation3], 1 }
 0x358   :  { %2443 = vsyncpa [#allocation3 + $0x1], 1 }

</bundles_post_ra>
